<compile_context>
chip_gen: v7x
topology: tpu7x:2x2x1
jax: 0.10.0
libtpu: 0.0.40
codegen_flags: <defaults>
</compile_context>

<pallas_src>
import functools

import jax
import jax.numpy as jnp
from jax import lax
from jax.experimental import pallas as pl
from jax.experimental.pallas import tpu as pltpu

BN_EPS = 1e-5
LEAKY_SLOPE = 0.01               # PyTorch nn.LeakyReLU default negative_slope
_VMEM_BUDGET = 40 * 1024 * 1024  # conservative: leaves headroom on v7x (64 MiB)


def _round_up(x, m):
    return (x + m - 1) // m * m


def _phase_taps(k, padding, r, stride):
    """Kernel taps contributing to output phase `r` of a stride-`stride`
    ConvTranspose, as (kernel_index, input_offset) pairs on the UN-dilated input:
        out[stride*q + r] += x[q + d] * w[ky]   for every (ky, d) returned."""
    taps = []
    for ky in range(k):
        if (r + padding - ky) % stride == 0:
            taps.append((ky, (r + padding - ky) // stride))
    return taps


def _vmem_estimate(tm, kp, cp):
    """Double-buffered VMEM footprint (bytes) of the larger of the two passes."""
    pass1 = 2 * tm * kp * 2 + 2 * kp * cp * 2 + 2 * tm * cp * 4 + 8 * cp * 4
    pass2 = 2 * tm * cp * 4 + 2 * tm * cp * 4 + 8 * cp * 4
    return max(pass1, pass2)


def _pick_tile_m(mq_max, kp, cp, tile_m):
    """Largest M-tile (multiple of 8) that keeps the pipeline inside the budget."""
    tm = max(min(_round_up(tile_m, 8), _round_up(mq_max, 8)), 8)
    while tm > 8 and _vmem_estimate(tm, kp, cp) > _VMEM_BUDGET:
        tm = max(_round_up(tm // 2, 8), 8)
    return tm


def _conv_stats_kernel(p_ref, w_ref, conv_ref, sum_ref, ssq_ref):
    """Pass 1: one phase's (tm, K) x (K, Cout) matmul.  Caches the f32 conv tile
    and accumulates per-phase per-channel sum / sum-of-squares for BN stats."""
    @pl.when(pl.program_id(1) == 0)
    def _():
        sum_ref[...] = jnp.zeros_like(sum_ref)
        ssq_ref[...] = jnp.zeros_like(ssq_ref)

    conv = jnp.dot(p_ref[0], w_ref[0], preferred_element_type=jnp.float32)
    conv_ref[0] = conv
    # Zero-padded rows / K-columns contribute exactly 0 -> no mask, no bias here.
    sum_ref[0] += jnp.sum(conv, axis=0, keepdims=True)
    ssq_ref[0] += jnp.sum(conv * conv, axis=0, keepdims=True)


def _bn_act_kernel(conv_ref, scale_ref, shift_ref, o_ref):
    """Pass 2: folded BatchNorm affine + LeakyReLU on the cached conv tile."""
    y = conv_ref[0] * scale_ref[...] + shift_ref[...]
    o_ref[0] = jnp.where(y >= 0, y, LEAKY_SLOPE * y)


@functools.partial(jax.jit, static_argnames=("stride", "padding", "tile_m"))
def upconv_block_forward(x, weight, bias, gamma, beta, *, stride=2, padding=1,
                         tile_m=1024):
    """x: (N, Cin, H, W) f32; weight: (Cin, Cout, KH, KW) (PyTorch ConvTranspose2d
    layout); bias/gamma/beta: (Cout,).  Returns NCHW f32 (training-mode BN)."""
    # The ConvTranspose bias shifts the batch mean by the same constant and
    # cancels exactly inside training-mode BatchNorm -> it never enters the math.
    del bias
    n, cin, h, w = x.shape
    cin_w, cout, kh, kw = weight.shape
    assert cin_w == cin
    ho = (h - 1) * stride - 2 * padding + kh
    wo = (w - 1) * stride - 2 * padding + kw
    num_phases = stride * stride

    # ---------- sub-pixel phase decomposition (no zero-dilated input) ----------
    taps_h = [_phase_taps(kh, padding, r, stride) for r in range(stride)]
    taps_w = [_phase_taps(kw, padding, r, stride) for r in range(stride)]
    hq = [max(0, -(-(ho - r) // stride)) for r in range(stride)]   # ceil((ho-r)/s)
    wq = [max(0, -(-(wo - r) // stride)) for r in range(stride)]
    phases = [(ry, rx) for ry in range(stride) for rx in range(stride)]

    all_dh = [d for tt in taps_h for (_, d) in tt]
    all_dw = [d for tt in taps_w for (_, d) in tt]
    pad_h_lo = max(0, -min(all_dh))
    pad_w_lo = max(0, -min(all_dw))
    pad_h_hi = max([d + hq[r] for r in range(stride) for (_, d) in taps_h[r]] + [h]) - h
    pad_w_hi = max([d + wq[r] for r in range(stride) for (_, d) in taps_w[r]] + [w]) - w

    x_nhwc = jnp.transpose(x, (0, 2, 3, 1))                        # channels-last
    xpad = jnp.pad(x_nhwc, ((0, 0), (pad_h_lo, pad_h_hi), (pad_w_lo, pad_w_hi), (0, 0)))

    mq_list = [n * hq[ry] * wq[rx] for (ry, rx) in phases]
    kp_list = [len(taps_h[ry]) * len(taps_w[rx]) * cin for (ry, rx) in phases]
    mq_max = max(mq_list + [8])
    cout_pad = _round_up(cout, 128)          # lane-dense stores / full MXU N width
    kp_pad = _round_up(max(kp_list + [1]), 16)
    tm = _pick_tile_m(mq_max, kp_pad, cout_pad, tile_m)
    mq_pad = _round_up(mq_max, tm)
    num_tiles = mq_pad // tm

    # Per-phase im2col on the UN-dilated input (cheap shifted slices, no zeros).
    # TODO(synk): fuse into pass 1 via a halo-banded input BlockSpec / manual DMA.
    patch_list, w_list = [], []
    for (ry, rx) in phases:
        slabs, wrows = [], []
        for (ky, dy) in taps_h[ry]:
            for (kx, dx) in taps_w[rx]:
                slabs.append(xpad[:, pad_h_lo + dy:pad_h_lo + dy + hq[ry],
                                  pad_w_lo + dx:pad_w_lo + dx + wq[rx], :])
                wrows.append(weight[:, :, ky, kx])                 # (Cin, Cout)
        t_p = len(slabs)
        p_mat = jnp.stack(slabs, axis=3).reshape(n * hq[ry] * wq[rx], t_p * cin)
        w_mat = jnp.stack(wrows, axis=0).reshape(t_p * cin, cout)
        patch_list.append(jnp.pad(p_mat, ((0, mq_pad - p_mat.shape[0]),
                                          (0, kp_pad - p_mat.shape[1]))))
        w_list.append(jnp.pad(w_mat, ((0, kp_pad - w_mat.shape[0]),
                                      (0, cout_pad - cout))))
    patches = jnp.stack(patch_list, axis=0).astype(jnp.bfloat16)   # (P, Mq, Kp)
    wstack = jnp.stack(w_list, axis=0).astype(jnp.bfloat16)        # (P, Kp, Coutp)

    vmem_limit = int(_vmem_estimate(tm, kp_pad, cout_pad) + (4 << 20))

    # ---- pass 1: phase matmuls + batch statistics (conv tiles cached to HBM) ----
    conv_hbm, psum, pssq = pl.pallas_call(
        _conv_stats_kernel,
        out_shape=(jax.ShapeDtypeStruct((num_phases, mq_pad, cout_pad), jnp.float32),
                   jax.ShapeDtypeStruct((num_phases, 1, cout_pad), jnp.float32),
                   jax.ShapeDtypeStruct((num_phases, 1, cout_pad), jnp.float32)),
        grid_spec=pltpu.PrefetchScalarGridSpec(
            num_scalar_prefetch=0,
            grid=(num_phases, num_tiles),
            in_specs=[pl.BlockSpec((1, tm, kp_pad), lambda p, i: (p, i, 0)),
                      pl.BlockSpec((1, kp_pad, cout_pad), lambda p, i: (p, 0, 0))],
            out_specs=(pl.BlockSpec((1, tm, cout_pad), lambda p, i: (p, i, 0)),
                       pl.BlockSpec((1, 1, cout_pad), lambda p, i: (p, 0, 0)),
                       pl.BlockSpec((1, 1, cout_pad), lambda p, i: (p, 0, 0))),
        ),
        compiler_params=pltpu.CompilerParams(
            dimension_semantics=("parallel", "arbitrary"),
            vmem_limit_bytes=vmem_limit),
    )(patches, wstack)

    # ---- finalize BN parameters (tiny per-channel math in plain JAX) ----
    m_valid = float(n * ho * wo)
    csum = jnp.sum(psum[:, 0, :], axis=0)                          # (Cout_pad,)
    cssq = jnp.sum(pssq[:, 0, :], axis=0)
    mean = csum / m_valid
    var = jnp.maximum(cssq / m_valid - mean * mean, 0.0)
    # TODO(synk): E[x^2]-E[x]^2 can lose precision when |mean| >> std; use a
    # two-level (per-tile mean) reduction if BN accuracy at extreme scales matters.
    inv_std = lax.rsqrt(var + BN_EPS)
    gamma_p = jnp.pad(gamma.astype(jnp.float32), (0, cout_pad - cout))
    beta_p = jnp.pad(beta.astype(jnp.float32), (0, cout_pad - cout))
    scale = (gamma_p * inv_std).reshape(1, cout_pad)
    shift = (beta_p - mean * gamma_p * inv_std).reshape(1, cout_pad)

    # ---- pass 2: folded BN affine + LeakyReLU on the cached conv ----
    out = pl.pallas_call(
        _bn_act_kernel,
        out_shape=jax.ShapeDtypeStruct((num_phases, mq_pad, cout_pad), jnp.float32),
        grid_spec=pltpu.PrefetchScalarGridSpec(
            num_scalar_prefetch=0,
            grid=(num_phases, num_tiles),
            in_specs=[pl.BlockSpec((1, tm, cout_pad), lambda p, i: (p, i, 0)),
                      pl.BlockSpec((1, cout_pad), lambda p, i: (0, 0)),
                      pl.BlockSpec((1, cout_pad), lambda p, i: (0, 0))],
            out_specs=pl.BlockSpec((1, tm, cout_pad), lambda p, i: (p, i, 0)),
        ),
        compiler_params=pltpu.CompilerParams(
            dimension_semantics=("parallel", "parallel"),
            vmem_limit_bytes=vmem_limit),
    )(conv_hbm, scale, shift)

    # ---- phase re-interleave back to NCHW (wrapper-side layout pass) ----
    same = all(hq[r] == hq[0] for r in range(stride)) and \
           all(wq[r] == wq[0] for r in range(stride))
    if same:
        hq0, wq0 = hq[0], wq[0]
        y = out[:, :n * hq0 * wq0, :cout].reshape(stride, stride, n, hq0, wq0, cout)
        y = jnp.transpose(y, (2, 3, 0, 4, 1, 5)).reshape(n, ho, wo, cout)
    else:  # odd output extents (odd kernel sizes): generic strided interleave
        y = jnp.zeros((n, ho, wo, cout), out.dtype)
        for pidx, (ry, rx) in enumerate(phases):
            blk = out[pidx, :n * hq[ry] * wq[rx], :cout].reshape(n, hq[ry], wq[rx], cout)
            y = y.at[:, ry::stride, rx::stride, :].set(blk)
    return jnp.transpose(y, (0, 3, 1, 2))  # NCHW to match the PyTorch module


def _reference(x, weight, bias, gamma, beta, *, stride=2, padding=1):
    # f32 reference on bf16-rounded operands (matches the kernel's MXU operand
    # precision; accumulation is f32 in both paths).
    xb = x.astype(jnp.bfloat16).astype(jnp.float32)
    wb = weight.astype(jnp.bfloat16).astype(jnp.float32)
    _, _, kh, kw = weight.shape
    w_conv = jnp.transpose(jnp.flip(wb, axis=(2, 3)), (1, 0, 2, 3))
    conv = lax.conv_general_dilated(
        xb, w_conv, window_strides=(1, 1),
        padding=((kh - 1 - padding, kh - 1 - padding),
                 (kw - 1 - padding, kw - 1 - padding)),
        lhs_dilation=(stride, stride),
        dimension_numbers=("NCHW", "OIHW", "NCHW"),
    ) + bias[None, :, None, None]
    mean = jnp.mean(conv, axis=(0, 2, 3), keepdims=True)
    var = jnp.mean((conv - mean) ** 2, axis=(0, 2, 3), keepdims=True)
    y = (conv - mean) * lax.rsqrt(var + BN_EPS)
    y = y * gamma[None, :, None, None] + beta[None, :, None, None]
    return jnp.where(y >= 0, y, LEAKY_SLOPE * y)


if __name__ == "__main__":
    key = jax.random.PRNGKey(0)
    k_x, k_w, k_b, k_g, k_be = jax.random.split(key, 5)

    N, CIN, COUT, H, W, KS = 2, 4, 8, 16, 16, 4
    STRIDE = 2
    PAD = KS // 2 - 1  # matches the PyTorch module: padding = kernel_size // 2 - 1

    x = jax.random.normal(k_x, (N, CIN, H, W), dtype=jnp.float32)
    fan_in = COUT * KS * KS
    bound = 1.0 / (fan_in ** 0.5)
    weight = jax.random.uniform(k_w, (CIN, COUT, KS, KS), jnp.float32, -bound, bound)
    bias = jax.random.uniform(k_b, (COUT,), jnp.float32, -bound, bound)
    gamma = 1.0 + 0.1 * jax.random.normal(k_g, (COUT,), jnp.float32)
    beta = 0.1 * jax.random.normal(k_be, (COUT,), jnp.float32)

    out = upconv_block_forward(x, weight, bias, gamma, beta, stride=STRIDE, padding=PAD)
    out = jax.block_until_ready(out)

    ref = _reference(x, weight, bias, gamma, beta, stride=STRIDE, padding=PAD)
    assert out.shape == (N, COUT, 2 * H, 2 * W), out.shape
    max_err = float(jnp.max(jnp.abs(out - ref)))
    assert jnp.allclose(out, ref, rtol=2e-3, atol=2e-3), max_err

    print("KERNEL_OK")
</pallas_src>

<mosaic_0001>
module attributes {stable_mosaic.version = 11 : i64} {
  func.func @_conv_stats_kernel(%arg0: i32, %arg1: i32, %arg2: memref<1x512x16xbf16, #tpu.memory_space<vmem>>, %arg3: memref<1x16x128xbf16, #tpu.memory_space<vmem>>, %arg4: memref<1x512x128xf32, #tpu.memory_space<vmem>>, %arg5: memref<1x1x128xf32, #tpu.memory_space<vmem>>, %arg6: memref<1x1x128xf32, #tpu.memory_space<vmem>>) attributes {dimension_semantics = [#tpu.dimension_semantics<parallel>, #tpu.dimension_semantics<arbitrary>], iteration_bounds = array<i64: 4, 1>, scalar_prefetch = 0 : i64, scratch_operands = 0 : i64, tpu.core_type = #tpu.core_type<tc>, window_params = [{transform_indices = @transform_0, window_bounds = array<i64: 1, 512, 16>}, {transform_indices = @transform_1, window_bounds = array<i64: 1, 16, 128>}, {transform_indices = @transform_2, window_bounds = array<i64: 1, 512, 128>}, {transform_indices = @transform_3, window_bounds = array<i64: 1, 1, 128>}, {transform_indices = @transform_4, window_bounds = array<i64: 1, 1, 128>}]} {
    %c0_i32 = arith.constant 0 : i32
    %0 = arith.cmpi eq, %arg1, %c0_i32 : i32
    %1 = arith.extui %0 : i1 to i32
    %c0_i32_0 = arith.constant 0 : i32
    %2 = arith.cmpi ne, %1, %c0_i32_0 : i32
    scf.if %2 {
      %cst_23 = arith.constant 0.000000e+00 : f32
      %28 = vector.broadcast %cst_23 : f32 to vector<1x1x128xf32>
      %c0_24 = arith.constant 0 : index
      %c0_25 = arith.constant 0 : index
      %c0_26 = arith.constant 0 : index
      %29 = vector.load %arg5[%c0_24, %c0_25, %c0_26] : memref<1x1x128xf32, #tpu.memory_space<vmem>>, vector<1x1x128xf32>
      tpu.vector_store %arg5[%c0_24, %c0_25, %c0_26], %28 {strides = array<i32>} : memref<1x1x128xf32, #tpu.memory_space<vmem>>, vector<1x1x128xf32>,
      %cst_27 = arith.constant 0.000000e+00 : f32
      %30 = vector.broadcast %cst_27 : f32 to vector<1x1x128xf32>
      %c0_28 = arith.constant 0 : index
      %c0_29 = arith.constant 0 : index
      %c0_30 = arith.constant 0 : index
      %31 = vector.load %arg6[%c0_28, %c0_29, %c0_30] : memref<1x1x128xf32, #tpu.memory_space<vmem>>, vector<1x1x128xf32>
      tpu.vector_store %arg6[%c0_28, %c0_29, %c0_30], %30 {strides = array<i32>} : memref<1x1x128xf32, #tpu.memory_space<vmem>>, vector<1x1x128xf32>,
    } else {
    }
    %c0 = arith.constant 0 : index
    %c0_1 = arith.constant 0 : index
    %c0_2 = arith.constant 0 : index
    %3 = vector.load %arg2[%c0, %c0_1, %c0_2] : memref<1x512x16xbf16, #tpu.memory_space<vmem>>, vector<1x512x16xbf16>
    %4 = vector.shape_cast %3 : vector<1x512x16xbf16> to vector<512x16xbf16>
    %c0_3 = arith.constant 0 : index
    %c0_4 = arith.constant 0 : index
    %c0_5 = arith.constant 0 : index
    %5 = vector.load %arg3[%c0_3, %c0_4, %c0_5] : memref<1x16x128xbf16, #tpu.memory_space<vmem>>, vector<1x16x128xbf16>
    %6 = vector.shape_cast %5 : vector<1x16x128xbf16> to vector<16x128xbf16>
    %cst = arith.constant dense<0.000000e+00> : vector<512x128xf32>
    %7 = tpu.matmul %4, %6, %cst {dimension_numbers = #tpu.dot_dimension_numbers<[1], [0], [0], [1], [0, 0, 1, 1], [], []>} : vector<512x16xbf16>, vector<16x128xbf16>, vector<512x128xf32> -> vector<512x128xf32>
    %c0_6 = arith.constant 0 : index
    %c0_7 = arith.constant 0 : index
    %c0_8 = arith.constant 0 : index
    %8 = vector.load %arg4[%c0_6, %c0_7, %c0_8] : memref<1x512x128xf32, #tpu.memory_space<vmem>>, vector<1x512x128xf32>
    %9 = vector.shape_cast %8 : vector<1x512x128xf32> to vector<512x128xf32>
    %10 = vector.shape_cast %7 : vector<512x128xf32> to vector<1x512x128xf32>
    tpu.vector_store %arg4[%c0_6, %c0_7, %c0_8], %10 {strides = array<i32>} : memref<1x512x128xf32, #tpu.memory_space<vmem>>, vector<1x512x128xf32>,
    %c0_9 = arith.constant 0 : index
    %c0_10 = arith.constant 0 : index
    %c0_11 = arith.constant 0 : index
    %11 = vector.load %arg5[%c0_9, %c0_10, %c0_11] : memref<1x1x128xf32, #tpu.memory_space<vmem>>, vector<1x1x128xf32>
    %12 = vector.shape_cast %11 : vector<1x1x128xf32> to vector<1x128xf32>
    %cst_12 = arith.constant dense<0.000000e+00> : vector<128xf32>
    %13 = vector.multi_reduction <add>, %7, %cst_12 [0] : vector<512x128xf32> to vector<128xf32>
    %14 = vector.shape_cast %13 : vector<128xf32> to vector<1x128xf32>
    %15 = arith.addf %12, %14 : vector<1x128xf32>
    %c0_13 = arith.constant 0 : index
    %c0_14 = arith.constant 0 : index
    %c0_15 = arith.constant 0 : index
    %16 = vector.load %arg5[%c0_13, %c0_14, %c0_15] : memref<1x1x128xf32, #tpu.memory_space<vmem>>, vector<1x1x128xf32>
    %17 = vector.shape_cast %16 : vector<1x1x128xf32> to vector<1x128xf32>
    %18 = vector.shape_cast %15 : vector<1x128xf32> to vector<1x1x128xf32>
    tpu.vector_store %arg5[%c0_13, %c0_14, %c0_15], %18 {strides = array<i32>} : memref<1x1x128xf32, #tpu.memory_space<vmem>>, vector<1x1x128xf32>,
    %c0_16 = arith.constant 0 : index
    %c0_17 = arith.constant 0 : index
    %c0_18 = arith.constant 0 : index
    %19 = vector.load %arg6[%c0_16, %c0_17, %c0_18] : memref<1x1x128xf32, #tpu.memory_space<vmem>>, vector<1x1x128xf32>
    %20 = vector.shape_cast %19 : vector<1x1x128xf32> to vector<1x128xf32>
    %21 = arith.mulf %7, %7 : vector<512x128xf32>
    %cst_19 = arith.constant dense<0.000000e+00> : vector<128xf32>
    %22 = vector.multi_reduction <add>, %21, %cst_19 [0] : vector<512x128xf32> to vector<128xf32>
    %23 = vector.shape_cast %22 : vector<128xf32> to vector<1x128xf32>
    %24 = arith.addf %20, %23 : vector<1x128xf32>
    %c0_20 = arith.constant 0 : index
    %c0_21 = arith.constant 0 : index
    %c0_22 = arith.constant 0 : index
    %25 = vector.load %arg6[%c0_20, %c0_21, %c0_22] : memref<1x1x128xf32, #tpu.memory_space<vmem>>, vector<1x1x128xf32>
    %26 = vector.shape_cast %25 : vector<1x1x128xf32> to vector<1x128xf32>
    %27 = vector.shape_cast %24 : vector<1x128xf32> to vector<1x1x128xf32>
    tpu.vector_store %arg6[%c0_20, %c0_21, %c0_22], %27 {strides = array<i32>} : memref<1x1x128xf32, #tpu.memory_space<vmem>>, vector<1x1x128xf32>,
    return
  }
  func.func @transform_0(%arg0: i32, %arg1: i32) -> (i32, i32, i32) {
    %c0_i32 = arith.constant 0 : i32
    %c0_i32_0 = arith.constant 0 : i32
    return %arg0, %arg1, %c0_i32 : i32, i32, i32
  }
  func.func @transform_1(%arg0: i32, %arg1: i32) -> (i32, i32, i32) {
    %c0_i32 = arith.constant 0 : i32
    %c0_i32_0 = arith.constant 0 : i32
    %c0_i32_1 = arith.constant 0 : i32
    return %arg0, %c0_i32, %c0_i32_0 : i32, i32, i32
  }
  func.func @transform_2(%arg0: i32, %arg1: i32) -> (i32, i32, i32) {
    %c0_i32 = arith.constant 0 : i32
    %c0_i32_0 = arith.constant 0 : i32
    return %arg0, %arg1, %c0_i32 : i32, i32, i32
  }
  func.func @transform_3(%arg0: i32, %arg1: i32) -> (i32, i32, i32) {
    %c0_i32 = arith.constant 0 : i32
    %c0_i32_0 = arith.constant 0 : i32
    %c0_i32_1 = arith.constant 0 : i32
    return %arg0, %c0_i32, %c0_i32_0 : i32, i32, i32
  }
  func.func @transform_4(%arg0: i32, %arg1: i32) -> (i32, i32, i32) {
    %c0_i32 = arith.constant 0 : i32
    %c0_i32_0 = arith.constant 0 : i32
    %c0_i32_1 = arith.constant 0 : i32
    return %arg0, %c0_i32, %c0_i32_0 : i32, i32, i32
  }
}

module attributes {stable_mosaic.version = 11 : i64} {
  func.func @_bn_act_kernel(%arg0: i32, %arg1: i32, %arg2: memref<1x512x128xf32, #tpu.memory_space<vmem>>, %arg3: memref<1x128xf32, #tpu.memory_space<vmem>>, %arg4: memref<1x128xf32, #tpu.memory_space<vmem>>, %arg5: memref<1x512x128xf32, #tpu.memory_space<vmem>>) attributes {dimension_semantics = [#tpu.dimension_semantics<parallel>, #tpu.dimension_semantics<parallel>], iteration_bounds = array<i64: 4, 1>, scalar_prefetch = 0 : i64, scratch_operands = 0 : i64, tpu.core_type = #tpu.core_type<tc>, window_params = [{transform_indices = @transform_0, window_bounds = array<i64: 1, 512, 128>}, {pipeline_mode = #tpu.pipeline_mode<synchronous>, transform_indices = @transform_1, window_bounds = array<i64: 1, 128>}, {pipeline_mode = #tpu.pipeline_mode<synchronous>, transform_indices = @transform_2, window_bounds = array<i64: 1, 128>}, {transform_indices = @transform_3, window_bounds = array<i64: 1, 512, 128>}]} {
    %c0 = arith.constant 0 : index
    %c0_0 = arith.constant 0 : index
    %c0_1 = arith.constant 0 : index
    %0 = vector.load %arg2[%c0, %c0_0, %c0_1] : memref<1x512x128xf32, #tpu.memory_space<vmem>>, vector<1x512x128xf32>
    %1 = vector.shape_cast %0 : vector<1x512x128xf32> to vector<512x128xf32>
    %c0_2 = arith.constant 0 : index
    %c0_3 = arith.constant 0 : index
    %2 = vector.load %arg3[%c0_2, %c0_3] : memref<1x128xf32, #tpu.memory_space<vmem>>, vector<1x128xf32>
    %3 = vector.broadcast %2 : vector<1x128xf32> to vector<512x128xf32>
    %4 = arith.mulf %1, %3 : vector<512x128xf32>
    %c0_4 = arith.constant 0 : index
    %c0_5 = arith.constant 0 : index
    %5 = vector.load %arg4[%c0_4, %c0_5] : memref<1x128xf32, #tpu.memory_space<vmem>>, vector<1x128xf32>
    %6 = vector.broadcast %5 : vector<1x128xf32> to vector<512x128xf32>
    %7 = arith.addf %4, %6 : vector<512x128xf32>
    %cst = arith.constant 0.000000e+00 : f32
    %8 = vector.broadcast %cst : f32 to vector<512x128xf32>
    %9 = arith.cmpf oge, %7, %8 : vector<512x128xf32>
    %cst_6 = arith.constant 0.00999999977 : f32
    %10 = vector.broadcast %cst_6 : f32 to vector<512x128xf32>
    %11 = arith.mulf %10, %7 : vector<512x128xf32>
    %12 = arith.select %9, %7, %11 : vector<512x128xi1>, vector<512x128xf32>
    %c0_7 = arith.constant 0 : index
    %c0_8 = arith.constant 0 : index
    %c0_9 = arith.constant 0 : index
    %13 = vector.load %arg5[%c0_7, %c0_8, %c0_9] : memref<1x512x128xf32, #tpu.memory_space<vmem>>, vector<1x512x128xf32>
    %14 = vector.shape_cast %13 : vector<1x512x128xf32> to vector<512x128xf32>
    %15 = vector.shape_cast %12 : vector<512x128xf32> to vector<1x512x128xf32>
    tpu.vector_store %arg5[%c0_7, %c0_8, %c0_9], %15 {strides = array<i32>} : memref<1x512x128xf32, #tpu.memory_space<vmem>>, vector<1x512x128xf32>,
    return
  }
  func.func @transform_0(%arg0: i32, %arg1: i32) -> (i32, i32, i32) {
    %c0_i32 = arith.constant 0 : i32
    %c0_i32_0 = arith.constant 0 : i32
    return %arg0, %arg1, %c0_i32 : i32, i32, i32
  }
  func.func @transform_1(%arg0: i32, %arg1: i32) -> (i32, i32) {
    %c0_i32 = arith.constant 0 : i32
    %c0_i32_0 = arith.constant 0 : i32
    %c0_i32_1 = arith.constant 0 : i32
    return %c0_i32, %c0_i32_0 : i32, i32
  }
  func.func @transform_2(%arg0: i32, %arg1: i32) -> (i32, i32) {
    %c0_i32 = arith.constant 0 : i32
    %c0_i32_0 = arith.constant 0 : i32
    %c0_i32_1 = arith.constant 0 : i32
    return %c0_i32, %c0_i32_0 : i32, i32
  }
  func.func @transform_3(%arg0: i32, %arg1: i32) -> (i32, i32, i32) {
    %c0_i32 = arith.constant 0 : i32
    %c0_i32_0 = arith.constant 0 : i32
    return %arg0, %arg1, %c0_i32 : i32, i32, i32
  }
}

</mosaic_0001>

<bundles_post_ra>
// kernel: upconv_block_forward.2
= control target key start
LH: loop header
LB: loop body
LE: loop exit
PB: predicated region body
PF: predicated region fallthrough
CT: control target
= control target key end

     0   :  { %s1610_s15 = smov 0   ;;  %s1612_s16 = smov 0   ;;  %s1993_s0 = inlined_call_operand.vmem [shape: bf16[4,512,16], index: 0, kind: input, shape index: {}]   ;;  %s1994_s1 = inlined_call_operand.vmem [shape: bf16[4,16,128], index: 1, kind: input, shape index: {}]   ;;  %s1995_s2 = inlined_call_operand.vmem [shape: f32[4,512,128], index: 2, kind: output, shape index: {0}]   ;;  %s1996_s3 = inlined_call_operand.vmem [shape: f32[4,1,128], index: 3, kind: output, shape index: {1}]   ;;  %s1997_s4 = inlined_call_operand.vmem [shape: f32[4,1,128], index: 4, kind: output, shape index: {2}]  }
   0x1   :  { %s1614_s17 = smov 0  }
   0x2 LB: > { %s27_s18 = sadd.s32 1, %s1578_s16  ;;  %p1324_p0 = scmp.ge.s32.totalorder %s1582_s17, 1  ;;  %s1582_s17 = sphi %s1614_s17, %s15_s17   ;;  %s1578_s16 = sphi %s1612_s16, %s1999_s16   ;;  %s1574_s15 = sphi %s1610_s15, %s1998_s15  }
   0x3   : > { %p29_p1 = scmp.ge.s32.totalorder %s27_s18, 4  ;;  %p198_p2 = scmp.lt.s32.totalorder %s1582_s17, 5 }
   0x5   : > { %s2001_s18 = smov (%p29_p1, %s27_s18), 0  ;;  %p199_p3 = pnand %p1324_p0, %p198_p2 }
   0x6   : > { %p244_p4 = scmp.lt.s32.totalorder (!%p199_p3), %s1574_s15, 3  ;;  %vm513_vm0 = vcmask (!%p199_p3), 130048   ;;  %v1584_v33 = vmov (!%p199_p3), 0.0  }
   0x7   : > { %202 = sbr.rel (%p199_p3) target bundleno = 380 (0x17c), region = 28 }
   0xe   : > { %s2003_s15 = smov (!%p244_p4, %s1574_s15), 3 }
   0xf   : > { %s1398_s19 = sshll.u32 %s2003_s15, 8  ;;  %s1399_s20 = sshll.u32 %s2003_s15, 3 }
  0x10   : > { %s1635_s23 = scalar_lea.vmem %s1993_s0, %s1398_s19  ;;  %s257_s26 = scalar_lea.vmem %s1994_s1, %s1399_s20 }
  0x11   : > { %v1527_v0 = vld [vmem:[%s257_s26] sm:$0xff]   ;;  %v1529_v2 = vld [vmem:[%s1635_s23 + $0x8] sm:$0xff]   ;;  %v1530_v3 = vld [vmem:[%s1635_s23 + $0x10] sm:$0xff]   ;;  %s1400_s27 = sshll.u32 %s2003_s15, 9  ;;  %s1709_s30 = scalar_lea.vmem %s1996_s3, %s2003_s15 }
  0x12   : > { %v1528_v1 = vld [vmem:[%s1635_s23] sm:$0xff]   ;;  %1434 = vmatprep.subr.bf16.mxu0 %v1527_v0  ;;  %1500 = vmatprep.subr.bf16.mxu1 %v1527_v0  ;;  %v1531_v4 = vld [vmem:[%s1635_s23 + $0x18] sm:$0xff]   ;;  %v1533_v6 = vld [vmem:[%s1635_s23 + $0x28] sm:$0xff]   ;;  %s1715_s7 = scalar_lea.vmem %s1997_s4, %s2003_s15  ;;  %279 = vst [vmem:[%s1709_s30] sm:$0x1] %v1584_v33  ;;  %s1722_s10 = scalar_lea.vmem %s1995_s2, %s1400_s27 }
  0x13   : > { %1435 = vmatpush3.bf16.msra.mxu0 %v1527_v0  ;;  %1436 = vmatprep.mubr.msk.bf16.mxu0 %vm513_vm0, %v1528_v1  ;;  %v1532_v5 = vld [vmem:[%s1635_s23 + $0x20] sm:$0xff]   ;;  %v1534_v7 = vld [vmem:[%s1635_s23 + $0x30] sm:$0xff]   ;;  %v1545_v9 = vld [vmem:[%s1635_s23 + $0x88] sm:$0xff]   ;;  %280 = vst [vmem:[%s1715_s7] sm:$0x1] %v1584_v33 }
  0x14   : > { %1501 = vmatpush3.bf16.msra.mxu1 %v1527_v0  ;;  %v1544_v8 = vld [vmem:[%s1635_s23 + $0x80] sm:$0xff]   ;;  %v1546_v10 = vld [vmem:[%s1635_s23 + $0x90] sm:$0xff]   ;;  %v1547_v11 = vld [vmem:[%s1635_s23 + $0x98] sm:$0xff]  }
  0x15   : > { %1468 = vmatprep.mubr.msk.bf16.mxu1 %vm513_vm0, %v1544_v8  ;;  %v1548_v12 = vld [vmem:[%s1635_s23 + $0xa0] sm:$0xff]   ;;  %v1535_v13 = vld [vmem:[%s1635_s23 + $0x38] sm:$0xff]   ;;  %v1549_v15 = vld [vmem:[%s1635_s23 + $0xa8] sm:$0xff]  }
  0x16   : > { %1437 = vmatmul.mubr.msk.bf16.vlgmr.msra.gmra.mrb[0].mxu0 %vm513_vm0, %v1529_v2  ;;  %v1536_v14 = vld [vmem:[%s1635_s23 + $0x40] sm:$0xff]   ;;  %v1550_v16 = vld [vmem:[%s1635_s23 + $0xb0] sm:$0xff]   ;;  %v1537_v17 = vld [vmem:[%s1635_s23 + $0x48] sm:$0xff]  }
  0x17   : > { %1440 = vmatprep.mubr.msk.bf16.mxu0 %vm513_vm0, %v1530_v3  ;;  %1469 = vmatmul.mubr.msk.bf16.vlgmr.msra.gmra.mrb[0].mxu1 %vm513_vm0, %v1545_v9  ;;  %v1538_v18 = vld [vmem:[%s1635_s23 + $0x50] sm:$0xff]   ;;  %v1551_v19 = vld [vmem:[%s1635_s23 + $0xb8] sm:$0xff]   ;;  %v1552_v20 = vld [vmem:[%s1635_s23 + $0xc0] sm:$0xff]  }
  0x18   : > { %1472 = vmatprep.mubr.msk.bf16.mxu1 %vm513_vm0, %v1546_v10  ;;  %v1539_v21 = vld [vmem:[%s1635_s23 + $0x58] sm:$0xff]   ;;  %v1540_v22 = vld [vmem:[%s1635_s23 + $0x60] sm:$0xff]   ;;  %v1553_v23 = vld [vmem:[%s1635_s23 + $0xc8] sm:$0xff]  }
  0x19   : > { %v1554_v24 = vld [vmem:[%s1635_s23 + $0xd0] sm:$0xff]   ;;  %v1541_v25 = vld [vmem:[%s1635_s23 + $0x68] sm:$0xff]   ;;  %v1555_v27 = vld [vmem:[%s1635_s23 + $0xd8] sm:$0xff]  }
  0x1a   : > { %v1542_v26 = vld [vmem:[%s1635_s23 + $0x70] sm:$0xff]   ;;  %v1556_v28 = vld [vmem:[%s1635_s23 + $0xe0] sm:$0xff]   ;;  %v1543_v29 = vld [vmem:[%s1635_s23 + $0x78] sm:$0xff]  }
  0x1b   : > { %v1557_v30 = vld [vmem:[%s1635_s23 + $0xe8] sm:$0xff]   ;;  %v1558_v31 = vld [vmem:[%s1635_s23 + $0xf0] sm:$0xff]   ;;  %v1559_v32 = vld [vmem:[%s1635_s23 + $0xf8] sm:$0xff]  }
  0x1e   : > { %1441 = vmatmul.mubr.msk.bf16.gmra.mrb[4].mxu0 %vm513_vm0, %v1531_v4 }
  0x1f   : > { %1444 = vmatprep.mubr.msk.bf16.mxu0 %vm513_vm0, %v1532_v5  ;;  %1473 = vmatmul.mubr.msk.bf16.gmra.mrb[4].mxu1 %vm513_vm0, %v1547_v11 }
  0x20   : > { %1476 = vmatprep.mubr.msk.bf16.mxu1 %vm513_vm0, %v1548_v12 }
  0x26   : > { %1445 = vmatmul.mubr.msk.bf16.gmra.mrb[8].mxu0 %vm513_vm0, %v1533_v6 }
  0x27   : > { %1448 = vmatprep.mubr.msk.bf16.mxu0 %vm513_vm0, %v1534_v7  ;;  %1477 = vmatmul.mubr.msk.bf16.gmra.mrb[8].mxu1 %vm513_vm0, %v1549_v15 }
  0x28   : > { %1480 = vmatprep.mubr.msk.bf16.mxu1 %vm513_vm0, %v1550_v16 }
  0x2e   : > { %1449 = vmatmul.mubr.msk.bf16.gmra.mrb[12].mxu0 %vm513_vm0, %v1535_v13 }
  0x2f   : > { %1452 = vmatprep.mubr.msk.bf16.mxu0 %vm513_vm0, %v1536_v14  ;;  %1481 = vmatmul.mubr.msk.bf16.gmra.mrb[12].mxu1 %vm513_vm0, %v1551_v19 }
  0x30   : > { %1484 = vmatprep.mubr.msk.bf16.mxu1 %vm513_vm0, %v1552_v20 }
  0x36   : > { %1453 = vmatmul.mubr.msk.bf16.gmra.mrb[16].mxu0 %vm513_vm0, %v1537_v17 }
  0x37   : > { %1456 = vmatprep.mubr.msk.bf16.mxu0 %vm513_vm0, %v1538_v18  ;;  %1485 = vmatmul.mubr.msk.bf16.gmra.mrb[16].mxu1 %vm513_vm0, %v1553_v23 }
  0x38   : > { %1488 = vmatprep.mubr.msk.bf16.mxu1 %vm513_vm0, %v1554_v24 }
  0x3e   : > { %1457 = vmatmul.mubr.msk.bf16.gmra.mrb[20].mxu0 %vm513_vm0, %v1539_v21 }
  0x3f   : > { %1460 = vmatprep.mubr.msk.bf16.mxu0 %vm513_vm0, %v1540_v22  ;;  %1489 = vmatmul.mubr.msk.bf16.gmra.mrb[20].mxu1 %vm513_vm0, %v1555_v27 }
  0x40   : > { %1492 = vmatprep.mubr.msk.bf16.mxu1 %vm513_vm0, %v1556_v28 }
  0x46   : > { %1461 = vmatmul.mubr.msk.bf16.gmra.mrb[24].mxu0 %vm513_vm0, %v1541_v25 }
  0x47   : > { %1464 = vmatprep.mubr.msk.bf16.mxu0 %vm513_vm0, %v1542_v26  ;;  %1493 = vmatmul.mubr.msk.bf16.gmra.mrb[24].mxu1 %vm513_vm0, %v1557_v30 }
  0x48   : > { %1496 = vmatprep.mubr.msk.bf16.mxu1 %vm513_vm0, %v1558_v31 }
  0x4e   : > { %1465 = vmatmul.mubr.msk.bf16.gmra.mrb[28].mxu0 %vm513_vm0, %v1543_v29 }
  0x4f   : > { %1497 = vmatmul.mubr.msk.bf16.gmra.mrb[28].mxu1 %vm513_vm0, %v1559_v32 }
  0xe9   : > { %v1438_v34 = vpop.f32.mrb[0].mxu0 }
  0xea   : > { %901 = vst [vmem:[%s1722_s10 + $0x10] sm:$0xff] %v1438_v34  ;;  %v644_v35 = vpop.f32.mrb[1].mxu0  ;;  %v1038_v41 = vmul.f32 %v1438_v34, %v1438_v34  ;;  %v1732_v60 = vpop.f32.mrb[0].mxu1 }
  0xeb   : > { %899 = vst [vmem:[%s1722_s10] sm:$0xff] %v644_v35  ;;  %v1439_v36 = vpop.f32.mrb[2].mxu0  ;;  %v1036_v38 = vmul.f32 %v644_v35, %v644_v35  ;;  %933 = vst [vmem:[%s1722_s10 + $0x110] sm:$0xff] %v1732_v60  ;;  %v1736_v61 = vpop.f32.mrb[1].mxu1 }
  0xec   : > { %902 = vst [vmem:[%s1722_s10 + $0x18] sm:$0xff] %v1439_v36  ;;  %v647_v37 = vpop.f32.mrb[3].mxu0  ;;  %v1039_v44 = vmul.f32 %v1439_v36, %v1439_v36  ;;  %931 = vst [vmem:[%s1722_s10 + $0x100] sm:$0xff] %v1736_v61  ;;  %v1740_v2 = vpop.f32.mrb[2].mxu1 }
  0xed   : > { %900 = vst [vmem:[%s1722_s10 + $0x8] sm:$0xff] %v647_v37  ;;  %v964_v39 = vadd.f32 %v647_v37, %v644_v35  ;;  %v1037_v40 = vmul.f32 %v647_v37, %v647_v37  ;;  %934 = vst [vmem:[%s1722_s10 + $0x118] sm:$0xff] %v1740_v2  ;;  %v1745_v4 = vpop.f32.mrb[3].mxu1 }
  0xee   : > { %932 = vst [vmem:[%s1722_s10 + $0x108] sm:$0xff] %v1745_v4 }
  0xef   : > { %v965_v42 = vadd.f32 %v1438_v34, %v964_v39  ;;  %v1100_v43 = vadd.f32 %v1037_v40, %v1036_v38 }
  0xf1   : > { %v1101_v45 = vadd.f32 %v1100_v43, %v1038_v41  ;;  %v1442_v46 = vpop.f32.mrb[4].mxu0  ;;  %v966_v47 = vadd.f32 %v1439_v36, %v965_v42 }
  0xf2   : > { %905 = vst [vmem:[%s1722_s10 + $0x30] sm:$0xff] %v1442_v46  ;;  %v660_v48 = vpop.f32.mrb[5].mxu0  ;;  %v1042_v57 = vmul.f32 %v1442_v46, %v1442_v46  ;;  %v1752_v16 = vpop.f32.mrb[4].mxu1 }
  0xf3   : > { %903 = vst [vmem:[%s1722_s10 + $0x20] sm:$0xff] %v660_v48  ;;  %v967_v49 = vadd.f32 %v966_v47, %v660_v48  ;;  %v1040_v50 = vmul.f32 %v660_v48, %v660_v48  ;;  %v1102_v51 = vadd.f32 %v1101_v45, %v1039_v44  ;;  %v1443_v52 = vpop.f32.mrb[6].mxu0  ;;  %937 = vst [vmem:[%s1722_s10 + $0x130] sm:$0xff] %v1752_v16  ;;  %v1756_v17 = vpop.f32.mrb[5].mxu1 }
  0xf4   : > { %906 = vst [vmem:[%s1722_s10 + $0x38] sm:$0xff] %v1443_v52  ;;  %v663_v53 = vpop.f32.mrb[7].mxu0  ;;  %v1043_v62 = vmul.f32 %v1443_v52, %v1443_v52  ;;  %935 = vst [vmem:[%s1722_s10 + $0x120] sm:$0xff] %v1756_v17  ;;  %v1760_v22 = vpop.f32.mrb[6].mxu1 }
  0xf5   : > { %v1103_v54 = vadd.f32 %v1102_v51, %v1040_v50  ;;  %904 = vst [vmem:[%s1722_s10 + $0x28] sm:$0xff] %v663_v53  ;;  %v968_v55 = vadd.f32 %v967_v49, %v663_v53  ;;  %v1041_v56 = vmul.f32 %v663_v53, %v663_v53  ;;  %938 = vst [vmem:[%s1722_s10 + $0x138] sm:$0xff] %v1760_v22  ;;  %v1765_v24 = vpop.f32.mrb[7].mxu1 }
  0xf6   : > { %936 = vst [vmem:[%s1722_s10 + $0x128] sm:$0xff] %v1765_v24 }
  0xf7   : > { %v969_v58 = vadd.f32 %v1442_v46, %v968_v55  ;;  %v1104_v59 = vadd.f32 %v1103_v54, %v1041_v56 }
  0xf9   : > { %v1105_v63 = vadd.f32 %v1104_v59, %v1042_v57  ;;  %v1446_v0 = vpop.f32.mrb[8].mxu0  ;;  %v970_v1 = vadd.f32 %v1443_v52, %v969_v58 }
  0xfa   : > { %909 = vst [vmem:[%s1722_s10 + $0x50] sm:$0xff] %v1446_v0  ;;  %v676_v3 = vpop.f32.mrb[9].mxu0  ;;  %v1046_v13 = vmul.f32 %v1446_v0, %v1446_v0  ;;  %v1772_v36 = vpop.f32.mrb[8].mxu1 }
  0xfb   : > { %907 = vst [vmem:[%s1722_s10 + $0x40] sm:$0xff] %v676_v3  ;;  %v971_v5 = vadd.f32 %v970_v1, %v676_v3  ;;  %v1044_v6 = vmul.f32 %v676_v3, %v676_v3  ;;  %v1106_v7 = vadd.f32 %v1105_v63, %v1043_v62  ;;  %v1447_v8 = vpop.f32.mrb[10].mxu0  ;;  %941 = vst [vmem:[%s1722_s10 + $0x150] sm:$0xff] %v1772_v36  ;;  %v1776_v37 = vpop.f32.mrb[9].mxu1 }
  0xfc   : > { %910 = vst [vmem:[%s1722_s10 + $0x58] sm:$0xff] %v1447_v8  ;;  %v679_v9 = vpop.f32.mrb[11].mxu0  ;;  %v1047_v18 = vmul.f32 %v1447_v8, %v1447_v8  ;;  %939 = vst [vmem:[%s1722_s10 + $0x140] sm:$0xff] %v1776_v37  ;;  %v1780_v42 = vpop.f32.mrb[10].mxu1 }
  0xfd   : > { %v1107_v10 = vadd.f32 %v1106_v7, %v1044_v6  ;;  %908 = vst [vmem:[%s1722_s10 + $0x48] sm:$0xff] %v679_v9  ;;  %v972_v11 = vadd.f32 %v971_v5, %v679_v9  ;;  %v1045_v12 = vmul.f32 %v679_v9, %v679_v9  ;;  %942 = vst [vmem:[%s1722_s10 + $0x158] sm:$0xff] %v1780_v42  ;;  %v1785_v44 = vpop.f32.mrb[11].mxu1 }
  0xfe   : > { %940 = vst [vmem:[%s1722_s10 + $0x148] sm:$0xff] %v1785_v44 }
  0xff   : > { %v973_v14 = vadd.f32 %v1446_v0, %v972_v11  ;;  %v1108_v15 = vadd.f32 %v1107_v10, %v1045_v12 }
 0x101   : > { %v1109_v19 = vadd.f32 %v1108_v15, %v1046_v13  ;;  %v1450_v20 = vpop.f32.mrb[12].mxu0  ;;  %v974_v21 = vadd.f32 %v1447_v8, %v973_v14 }
 0x102   : > { %913 = vst [vmem:[%s1722_s10 + $0x70] sm:$0xff] %v1450_v20  ;;  %v692_v23 = vpop.f32.mrb[13].mxu0  ;;  %v1050_v33 = vmul.f32 %v1450_v20, %v1450_v20  ;;  %v1792_v56 = vpop.f32.mrb[12].mxu1 }
 0x103   : > { %911 = vst [vmem:[%s1722_s10 + $0x60] sm:$0xff] %v692_v23  ;;  %v975_v25 = vadd.f32 %v974_v21, %v692_v23  ;;  %v1048_v26 = vmul.f32 %v692_v23, %v692_v23  ;;  %v1110_v27 = vadd.f32 %v1109_v19, %v1047_v18  ;;  %v1451_v28 = vpop.f32.mrb[14].mxu0  ;;  %945 = vst [vmem:[%s1722_s10 + $0x170] sm:$0xff] %v1792_v56  ;;  %v1796_v57 = vpop.f32.mrb[13].mxu1 }
 0x104   : > { %914 = vst [vmem:[%s1722_s10 + $0x78] sm:$0xff] %v1451_v28  ;;  %v695_v29 = vpop.f32.mrb[15].mxu0  ;;  %v1051_v38 = vmul.f32 %v1451_v28, %v1451_v28  ;;  %943 = vst [vmem:[%s1722_s10 + $0x160] sm:$0xff] %v1796_v57  ;;  %v1800_v0 = vpop.f32.mrb[14].mxu1 }
 0x105   : > { %v1111_v30 = vadd.f32 %v1110_v27, %v1048_v26  ;;  %912 = vst [vmem:[%s1722_s10 + $0x68] sm:$0xff] %v695_v29  ;;  %v976_v31 = vadd.f32 %v975_v25, %v695_v29  ;;  %v1049_v32 = vmul.f32 %v695_v29, %v695_v29  ;;  %946 = vst [vmem:[%s1722_s10 + $0x178] sm:$0xff] %v1800_v0  ;;  %v1805_v3 = vpop.f32.mrb[15].mxu1 }
 0x106   : > { %944 = vst [vmem:[%s1722_s10 + $0x168] sm:$0xff] %v1805_v3 }
 0x107   : > { %v977_v34 = vadd.f32 %v1450_v20, %v976_v31  ;;  %v1112_v35 = vadd.f32 %v1111_v30, %v1049_v32 }
 0x109   : > { %v1113_v39 = vadd.f32 %v1112_v35, %v1050_v33  ;;  %v1454_v40 = vpop.f32.mrb[16].mxu0  ;;  %v978_v41 = vadd.f32 %v1451_v28, %v977_v34 }
 0x10a   : > { %917 = vst [vmem:[%s1722_s10 + $0x90] sm:$0xff] %v1454_v40  ;;  %v708_v43 = vpop.f32.mrb[17].mxu0  ;;  %v1054_v53 = vmul.f32 %v1454_v40, %v1454_v40  ;;  %v1812_v18 = vpop.f32.mrb[16].mxu1 }
 0x10b   : > { %915 = vst [vmem:[%s1722_s10 + $0x80] sm:$0xff] %v708_v43  ;;  %v979_v45 = vadd.f32 %v978_v41, %v708_v43  ;;  %v1052_v46 = vmul.f32 %v708_v43, %v708_v43  ;;  %v1114_v47 = vadd.f32 %v1113_v39, %v1051_v38  ;;  %v1455_v48 = vpop.f32.mrb[18].mxu0  ;;  %949 = vst [vmem:[%s1722_s10 + $0x190] sm:$0xff] %v1812_v18  ;;  %v1816_v19 = vpop.f32.mrb[17].mxu1 }
 0x10c   : > { %918 = vst [vmem:[%s1722_s10 + $0x98] sm:$0xff] %v1455_v48  ;;  %v711_v49 = vpop.f32.mrb[19].mxu0  ;;  %v1055_v58 = vmul.f32 %v1455_v48, %v1455_v48  ;;  %947 = vst [vmem:[%s1722_s10 + $0x180] sm:$0xff] %v1816_v19  ;;  %v1820_v26 = vpop.f32.mrb[18].mxu1 }
 0x10d   : > { %v1115_v50 = vadd.f32 %v1114_v47, %v1052_v46  ;;  %916 = vst [vmem:[%s1722_s10 + $0x88] sm:$0xff] %v711_v49  ;;  %v980_v51 = vadd.f32 %v979_v45, %v711_v49  ;;  %v1053_v52 = vmul.f32 %v711_v49, %v711_v49  ;;  %950 = vst [vmem:[%s1722_s10 + $0x198] sm:$0xff] %v1820_v26  ;;  %v1825_v28 = vpop.f32.mrb[19].mxu1 }
 0x10e   : > { %948 = vst [vmem:[%s1722_s10 + $0x188] sm:$0xff] %v1825_v28 }
 0x10f   : > { %v981_v54 = vadd.f32 %v1454_v40, %v980_v51  ;;  %v1116_v55 = vadd.f32 %v1115_v50, %v1053_v52 }
 0x111   : > { %v1117_v59 = vadd.f32 %v1116_v55, %v1054_v53  ;;  %v1458_v62 = vpop.f32.mrb[20].mxu0  ;;  %v982_v63 = vadd.f32 %v1455_v48, %v981_v54 }
 0x112   : > { %921 = vst [vmem:[%s1722_s10 + $0xb0] sm:$0xff] %v1458_v62  ;;  %v724_v1 = vpop.f32.mrb[21].mxu0  ;;  %v1058_v13 = vmul.f32 %v1458_v62, %v1458_v62  ;;  %v1832_v43 = vpop.f32.mrb[20].mxu1 }
 0x113   : > { %919 = vst [vmem:[%s1722_s10 + $0xa0] sm:$0xff] %v724_v1  ;;  %v983_v5 = vadd.f32 %v982_v63, %v724_v1  ;;  %v1056_v6 = vmul.f32 %v724_v1, %v724_v1  ;;  %v1118_v7 = vadd.f32 %v1117_v59, %v1055_v58  ;;  %v1459_v8 = vpop.f32.mrb[22].mxu0  ;;  %953 = vst [vmem:[%s1722_s10 + $0x1b0] sm:$0xff] %v1832_v43  ;;  %v1836_v45 = vpop.f32.mrb[21].mxu1 }
 0x114   : > { %922 = vst [vmem:[%s1722_s10 + $0xb8] sm:$0xff] %v1459_v8  ;;  %v727_v9 = vpop.f32.mrb[23].mxu0  ;;  %v1059_v20 = vmul.f32 %v1459_v8, %v1459_v8  ;;  %951 = vst [vmem:[%s1722_s10 + $0x1a0] sm:$0xff] %v1836_v45  ;;  %v1840_v50 = vpop.f32.mrb[22].mxu1 }
 0x115   : > { %v1119_v10 = vadd.f32 %v1118_v7, %v1056_v6  ;;  %920 = vst [vmem:[%s1722_s10 + $0xa8] sm:$0xff] %v727_v9  ;;  %v984_v11 = vadd.f32 %v983_v5, %v727_v9  ;;  %v1057_v12 = vmul.f32 %v727_v9, %v727_v9  ;;  %954 = vst [vmem:[%s1722_s10 + $0x1b8] sm:$0xff] %v1840_v50  ;;  %v1845_v52 = vpop.f32.mrb[23].mxu1 }
 0x116   : > { %952 = vst [vmem:[%s1722_s10 + $0x1a8] sm:$0xff] %v1845_v52 }
 0x117   : > { %v985_v14 = vadd.f32 %v1458_v62, %v984_v11  ;;  %v1120_v15 = vadd.f32 %v1119_v10, %v1057_v12 }
 0x119   : > { %v1121_v21 = vadd.f32 %v1120_v15, %v1058_v13  ;;  %v1462_v23 = vpop.f32.mrb[24].mxu0  ;;  %v986_v25 = vadd.f32 %v1459_v8, %v985_v14  ;;  %v1068_v13 = vmul.f32 %v1736_v61, %v1736_v61 }
 0x11a   : > { %925 = vst [vmem:[%s1722_s10 + $0xd0] sm:$0xff] %v1462_v23  ;;  %v740_v27 = vpop.f32.mrb[25].mxu0  ;;  %v1062_v39 = vmul.f32 %v1462_v23, %v1462_v23  ;;  %v1852_v8 = vpop.f32.mrb[24].mxu1 }
 0x11b   : > { %923 = vst [vmem:[%s1722_s10 + $0xc0] sm:$0xff] %v740_v27  ;;  %v987_v29 = vadd.f32 %v986_v25, %v740_v27  ;;  %v1060_v30 = vmul.f32 %v740_v27, %v740_v27  ;;  %v1122_v31 = vadd.f32 %v1121_v21, %v1059_v20  ;;  %v1463_v32 = vpop.f32.mrb[26].mxu0  ;;  %957 = vst [vmem:[%s1722_s10 + $0x1d0] sm:$0xff] %v1852_v8  ;;  %v1856_v9 = vpop.f32.mrb[25].mxu1 }
 0x11c   : > { %926 = vst [vmem:[%s1722_s10 + $0xd8] sm:$0xff] %v1463_v32  ;;  %v743_v33 = vpop.f32.mrb[27].mxu0  ;;  %v1063_v46 = vmul.f32 %v1463_v32, %v1463_v32  ;;  %955 = vst [vmem:[%s1722_s10 + $0x1c0] sm:$0xff] %v1856_v9  ;;  %v1862_v14 = vpop.f32.mrb[26].mxu1  ;;  %v1069_v27 = vmul.f32 %v1745_v4, %v1745_v4 }
 0x11d   : > { %v1123_v34 = vadd.f32 %v1122_v31, %v1060_v30  ;;  %924 = vst [vmem:[%s1722_s10 + $0xc8] sm:$0xff] %v743_v33  ;;  %v988_v35 = vadd.f32 %v987_v29, %v743_v33  ;;  %v1061_v38 = vmul.f32 %v743_v33, %v743_v33  ;;  %958 = vst [vmem:[%s1722_s10 + $0x1d8] sm:$0xff] %v1862_v14  ;;  %v1866_v15 = vpop.f32.mrb[27].mxu1 }
 0x11e   : > { %956 = vst [vmem:[%s1722_s10 + $0x1c8] sm:$0xff] %v1866_v15  ;;  %v1070_v29 = vmul.f32 %v1732_v60, %v1732_v60  ;;  %v1071_v33 = vmul.f32 %v1740_v2, %v1740_v2 }
 0x11f   : > { %v989_v40 = vadd.f32 %v1462_v23, %v988_v35  ;;  %v1124_v41 = vadd.f32 %v1123_v34, %v1061_v38 }
 0x121   : > { %v1125_v47 = vadd.f32 %v1124_v41, %v1062_v39  ;;  %v1466_v48 = vpop.f32.mrb[28].mxu0  ;;  %v990_v49 = vadd.f32 %v1463_v32, %v989_v40 }
 0x122   : > { %929 = vst [vmem:[%s1722_s10 + $0xf0] sm:$0xff] %v1466_v48  ;;  %v756_v51 = vpop.f32.mrb[29].mxu0  ;;  %v1066_v5 = vmul.f32 %v1466_v48, %v1466_v48  ;;  %v1877_v32 = vpop.f32.mrb[28].mxu1 }
 0x123   : > { %927 = vst [vmem:[%s1722_s10 + $0xe0] sm:$0xff] %v756_v51  ;;  %v991_v53 = vadd.f32 %v990_v49, %v756_v51  ;;  %v1064_v54 = vmul.f32 %v756_v51, %v756_v51  ;;  %v1126_v55 = vadd.f32 %v1125_v47, %v1063_v46  ;;  %v1467_v58 = vpop.f32.mrb[30].mxu0  ;;  %961 = vst [vmem:[%s1722_s10 + $0x1f0] sm:$0xff] %v1877_v32 }
 0x124   : > { %930 = vst [vmem:[%s1722_s10 + $0xf8] sm:$0xff] %v1467_v58  ;;  %v759_v59 = vpop.f32.mrb[31].mxu0  ;;  %v1067_v10 = vmul.f32 %v1467_v58, %v1467_v58  ;;  %v1074_v47 = vmul.f32 %v1752_v16, %v1752_v16  ;;  %v1075_v51 = vmul.f32 %v1760_v22, %v1760_v22 }
 0x125   : > { %v1127_v62 = vadd.f32 %v1126_v55, %v1064_v54  ;;  %928 = vst [vmem:[%s1722_s10 + $0xe8] sm:$0xff] %v759_v59  ;;  %v992_v63 = vadd.f32 %v991_v53, %v759_v59  ;;  %v1065_v1 = vmul.f32 %v759_v59, %v759_v59  ;;  %v1076_v54 = vmul.f32 %v1776_v37, %v1776_v37 }
 0x127   : > { %v993_v6 = vadd.f32 %v1466_v48, %v992_v63  ;;  %v1128_v7 = vadd.f32 %v1127_v62, %v1065_v1  ;;  %v1077_v62 = vmul.f32 %v1785_v44, %v1785_v44 }
 0x129   : > { %v1129_v11 = vadd.f32 %v1128_v7, %v1066_v5  ;;  %v994_v12 = vadd.f32 %v1467_v58, %v993_v6 }
 0x12b   : > { %v995_v20 = vadd.f32 %v994_v12, %v1736_v61  ;;  %v1130_v21 = vadd.f32 %v1129_v11, %v1067_v10  ;;  %v1881_v61 = vpop.f32.mrb[29].mxu1  ;;  %v1081_v12 = vmul.f32 %v1805_v3, %v1805_v3 }
 0x12c   : > { %959 = vst [vmem:[%s1722_s10 + $0x1e0] sm:$0xff] %v1881_v61  ;;  %v1890_v38 = vpop.f32.mrb[30].mxu1 }
 0x12d   : > { %v1131_v23 = vadd.f32 %v1130_v21, %v1068_v13  ;;  %v996_v25 = vadd.f32 %v995_v20, %v1745_v4  ;;  %v1072_v4 = vmul.f32 %v1756_v17, %v1756_v17  ;;  %962 = vst [vmem:[%s1722_s10 + $0x1f8] sm:$0xff] %v1890_v38 }
 0x12f   : > { %v997_v30 = vadd.f32 %v1732_v60, %v996_v25  ;;  %v1132_v31 = vadd.f32 %v1131_v23, %v1069_v27  ;;  %v1894_v60 = vpop.f32.mrb[31].mxu1 }
 0x130   : > { %960 = vst [vmem:[%s1722_s10 + $0x1e8] sm:$0xff] %v1894_v60 }
 0x131   : > { %v1133_v34 = vadd.f32 %v1132_v31, %v1070_v29  ;;  %v998_v35 = vadd.f32 %v1740_v2, %v997_v30  ;;  %v1073_v2 = vmul.f32 %v1765_v24, %v1765_v24  ;;  %v1085_v30 = vmul.f32 %v1825_v28, %v1825_v28 }
 0x133   : > { %v999_v39 = vadd.f32 %v998_v35, %v1756_v17  ;;  %v1134_v40 = vadd.f32 %v1133_v34, %v1071_v33 }
 0x135   : > { %v1135_v41 = vadd.f32 %v1134_v40, %v1072_v4  ;;  %v1000_v46 = vadd.f32 %v999_v39, %v1765_v24 }
 0x137   : > { %v1001_v48 = vadd.f32 %v1752_v16, %v1000_v46  ;;  %v1136_v49 = vadd.f32 %v1135_v41, %v1073_v2  ;;  %v1078_v16 = vmul.f32 %v1772_v36, %v1772_v36  ;;  %v1089_v41 = vmul.f32 %v1845_v52, %v1845_v52 }
 0x139   : > { %v1137_v53 = vadd.f32 %v1136_v49, %v1074_v47  ;;  %v1002_v17 = vadd.f32 %v1760_v22, %v1001_v48  ;;  %v1079_v22 = vmul.f32 %v1780_v42, %v1780_v42 }
 0x13b   : > { %v1003_v55 = vadd.f32 %v1002_v17, %v1776_v37  ;;  %v1138_v58 = vadd.f32 %v1137_v53, %v1075_v51  ;;  %v1080_v37 = vmul.f32 %v1796_v57, %v1796_v57  ;;  %v1093_v17 = vmul.f32 %v1866_v15, %v1866_v15 }
 0x13d   : > { %v1139_v59 = vadd.f32 %v1138_v58, %v1076_v54  ;;  %v1004_v24 = vadd.f32 %v1003_v55, %v1785_v44 }
 0x13f   : > { %v1005_v63 = vadd.f32 %v1772_v36, %v1004_v24  ;;  %v1140_v1 = vadd.f32 %v1139_v59, %v1077_v62  ;;  %v1082_v36 = vmul.f32 %v1792_v56, %v1792_v56 }
 0x141   : > { %v1141_v5 = vadd.f32 %v1140_v1, %v1078_v16  ;;  %v1006_v6 = vadd.f32 %v1780_v42, %v1005_v63  ;;  %v1083_v42 = vmul.f32 %v1800_v0, %v1800_v0  ;;  %v1097_v63 = vmul.f32 %v1894_v60, %v1894_v60 }
 0x143   : > { %v1007_v7 = vadd.f32 %v1006_v6, %v1796_v57  ;;  %v1142_v10 = vadd.f32 %v1141_v5, %v1079_v22  ;;  %v1084_v57 = vmul.f32 %v1816_v19, %v1816_v19 }
 0x145   : > { %v1143_v11 = vadd.f32 %v1142_v10, %v1080_v37  ;;  %v1008_v44 = vadd.f32 %v1007_v7, %v1805_v3 }
 0x147   : > { %v1009_v13 = vadd.f32 %v1792_v56, %v1008_v44  ;;  %v1144_v20 = vadd.f32 %v1143_v11, %v1081_v12  ;;  %v1086_v56 = vmul.f32 %v1812_v18, %v1812_v18 }
 0x149   : > { %v1145_v21 = vadd.f32 %v1144_v20, %v1082_v36  ;;  %v1010_v23 = vadd.f32 %v1800_v0, %v1009_v13  ;;  %v1087_v0 = vmul.f32 %v1820_v26, %v1820_v26  ;;  %v963_v13 = vld [vmem:[%s1709_s30] sm:$0x1] }
 0x14b   : > { %v1011_v25 = vadd.f32 %v1010_v23, %v1816_v19  ;;  %v1146_v27 = vadd.f32 %v1145_v21, %v1083_v42  ;;  %v1088_v19 = vmul.f32 %v1836_v45, %v1836_v45  ;;  %v1035_v21 = vld [vmem:[%s1715_s7] sm:$0x1] }
 0x14d   : > { %v1147_v29 = vadd.f32 %v1146_v27, %v1084_v57  ;;  %v1012_v3 = vadd.f32 %v1011_v25, %v1825_v28 }
 0x14f   : > { %v1013_v31 = vadd.f32 %v1812_v18, %v1012_v3  ;;  %v1148_v33 = vadd.f32 %v1147_v29, %v1085_v30  ;;  %v1090_v18 = vmul.f32 %v1832_v43, %v1832_v43 }
 0x151   : > { %v1149_v34 = vadd.f32 %v1148_v33, %v1086_v56  ;;  %v1014_v35 = vadd.f32 %v1820_v26, %v1013_v31  ;;  %v1091_v26 = vmul.f32 %v1840_v50, %v1840_v50 }
 0x153   : > { %v1015_v4 = vadd.f32 %v1014_v35, %v1836_v45  ;;  %v1150_v39 = vadd.f32 %v1149_v34, %v1087_v0  ;;  %v1092_v45 = vmul.f32 %v1856_v9, %v1856_v9 }
 0x155   : > { %v1151_v40 = vadd.f32 %v1150_v39, %v1088_v19  ;;  %v1016_v28 = vadd.f32 %v1015_v4, %v1845_v52 }
 0x157   : > { %v1017_v46 = vadd.f32 %v1832_v43, %v1016_v28  ;;  %v1152_v2 = vadd.f32 %v1151_v40, %v1089_v41  ;;  %v1094_v43 = vmul.f32 %v1852_v8, %v1852_v8 }
 0x159   : > { %v1153_v47 = vadd.f32 %v1152_v2, %v1090_v18  ;;  %v1018_v48 = vadd.f32 %v1840_v50, %v1017_v46  ;;  %v1095_v50 = vmul.f32 %v1862_v14, %v1862_v14 }
 0x15b   : > { %v1019_v49 = vadd.f32 %v1018_v48, %v1856_v9  ;;  %v1154_v51 = vadd.f32 %v1153_v47, %v1091_v26  ;;  %v1096_v9 = vmul.f32 %v1881_v61, %v1881_v61 }
 0x15d   : > { %v1155_v53 = vadd.f32 %v1154_v51, %v1092_v45  ;;  %v1020_v52 = vadd.f32 %v1019_v49, %v1866_v15 }
 0x15f   : > { %v1021_v54 = vadd.f32 %v1852_v8, %v1020_v52  ;;  %v1156_v55 = vadd.f32 %v1155_v53, %v1093_v17  ;;  %v1098_v8 = vmul.f32 %v1877_v32, %v1877_v32 }
 0x161   : > { %v1157_v58 = vadd.f32 %v1156_v55, %v1094_v43  ;;  %v1022_v59 = vadd.f32 %v1862_v14, %v1021_v54  ;;  %v1099_v14 = vmul.f32 %v1890_v38, %v1890_v38 }
 0x163   : > { %v1023_v24 = vadd.f32 %v1022_v59, %v1881_v61  ;;  %v1158_v62 = vadd.f32 %v1157_v58, %v1095_v50 }
 0x165   : > { %v1159_v16 = vadd.f32 %v1158_v62, %v1096_v9  ;;  %v1024_v15 = vadd.f32 %v1023_v24, %v1894_v60 }
 0x167   : > { %v1025_v1 = vadd.f32 %v1877_v32, %v1024_v15  ;;  %v1160_v22 = vadd.f32 %v1159_v16, %v1097_v63 }
 0x169   : > { %v1026_v61 = vadd.f32 %v1890_v38, %v1025_v1  ;;  %v1161_v5 = vadd.f32 %v1160_v22, %v1098_v8 }
 0x16b   : > { %v1027_v6 = vrot.slane %v1026_v61, 4  ;;  %v1162_v37 = vadd.f32 %v1161_v5, %v1099_v14 }
 0x16d   : > { %v1028_v7 = vadd.f32 %v1027_v6, %v1026_v61  ;;  %v1163_v60 = vrot.slane %v1162_v37, 4 }
 0x16f   : > { %v1029_v10 = vrot.slane %v1028_v7, 2  ;;  %v1164_v11 = vadd.f32 %v1163_v60, %v1162_v37 }
 0x171   : > { %v1030_v44 = vadd.f32 %v1029_v10, %v1028_v7  ;;  %v1165_v12 = vrot.slane %v1164_v11, 2 }
 0x173   : > { %v1031_v36 = vrot.slane %v1030_v44, 1  ;;  %v1166_v32 = vadd.f32 %v1165_v12, %v1164_v11 }
 0x175   : > { %v1032_v20 = vadd.f32 %v1031_v36, %v1030_v44  ;;  %v1167_v42 = vrot.slane %v1166_v32, 1 }
 0x177   : > { %v1033_v23 = vadd.f32 %v1032_v20, %v963_v13  ;;  %v1168_v57 = vadd.f32 %v1167_v42, %v1166_v32 }
 0x179   : > { %1034 = vst [vmem:[%s1709_s30] sm:$0x1] %v1033_v23  ;;  %v1169_v38 = vadd.f32 %v1168_v57, %v1035_v21 }
 0x17b   : > { %1170 = vst [vmem:[%s1715_s7] sm:$0x1] %v1169_v38 }
 0x17c PF: > { %s15_s17 = sadd.s32 1, %s1582_s17   ;;  %s1998_s15 = smov %s1578_s16 }
 0x17d   : > { %p12_p5 = scmp.ge.s32.totalorder %s15_s17, 6   ;;  %s1999_s16 = smov %s2001_s18 }
 0x17f   :  { %14 = sbr.rel (!%p12_p5) target bundleno = 2 (0x2), region = 89 }

// kernel: upconv_block_forward.3
= control target key start
LH: loop header
LB: loop body
LE: loop exit
PB: predicated region body
PF: predicated region fallthrough
CT: control target
= control target key end

     0   :  { %s842_s12 = smov 0   ;;  %s844_s13 = smov 0   ;;  %s1148_s0 = inlined_call_operand.vmem [shape: f32[4,512,128], index: 0, kind: input, shape index: {}]   ;;  %s1149_s1 = inlined_call_operand.vmem [shape: f32[1,128], index: 1, kind: input, shape index: {}]   ;;  %s1150_s2 = inlined_call_operand.vmem [shape: f32[1,128], index: 2, kind: input, shape index: {}]   ;;  %s1151_s3 = inlined_call_operand.vmem [shape: f32[4,512,128], index: 3, kind: output, shape index: {}]  }
   0x1   :  { %s846_s14 = smov 0  }
   0x2 LB: > { %s25_s15 = sadd.s32 1, %s816_s13  ;;  %p763_p0 = scmp.ge.s32.totalorder %s820_s14, 1  ;;  %s820_s14 = sphi %s846_s14, %s13_s14   ;;  %s816_s13 = sphi %s844_s13, %s1153_s13   ;;  %s812_s12 = sphi %s842_s12, %s1152_s12  }
   0x3   : > { %p27_p1 = scmp.ge.s32.totalorder %s25_s15, 4  ;;  %p158_p2 = scmp.lt.s32.totalorder %s820_s14, 5 }
   0x5   : > { %s1155_s15 = smov (%p27_p1, %s25_s15), 0  ;;  %p159_p3 = pnand %p763_p0, %p158_p2 }
   0x6   : > { %p191_p4 = scmp.lt.s32.totalorder (!%p159_p3), %s812_s12, 3  ;;  %v866_v0 = vld [vmem:[%s1149_s1] ss:$0 sm:$0xff] (!%p159_p3) }
   0x7   : > { %162 = sbr.rel (%p159_p3) target bundleno = 103 (0x67), region = 32  ;;  %v876_v1 = vld [vmem:[%s1150_s2] ss:$0 sm:$0xff] (!%p159_p3) }
   0xe   : > { %s1157_s12 = smov (!%p191_p4, %s812_s12), 3 }
   0xf   : > { %s772_s16 = sshll.u32 %s1157_s12, 9 }
  0x10   : > { %s871_s21 = scalar_lea.vmem %s1148_s0, %s772_s16  ;;  %s904_s26 = scalar_lea.vmem %s1151_s3, %s772_s16 }
  0x11   : > { %v210_v2 = vld [vmem:[%s871_s21] sm:$0xff]  ;;  %v211_v3 = vld [vmem:[%s871_s21 + $0x8] sm:$0xff]  ;;  %v212_v4 = vld [vmem:[%s871_s21 + $0x10] sm:$0xff] }
  0x12   : > { %v281_v5 = vmul.f32 %v866_v0, %v210_v2  ;;  %v282_v6 = vmul.f32 %v866_v0, %v211_v3  ;;  %v283_v7 = vmul.f32 %v866_v0, %v212_v4  ;;  %v213_v8 = vld [vmem:[%s871_s21 + $0x18] sm:$0xff]  ;;  %v214_v9 = vld [vmem:[%s871_s21 + $0x20] sm:$0xff]  ;;  %v215_v10 = vld [vmem:[%s871_s21 + $0x28] sm:$0xff] }
  0x13   : > { %v284_v11 = vmul.f32 %v866_v0, %v213_v8  ;;  %v285_v12 = vmul.f32 %v866_v0, %v214_v9  ;;  %v286_v13 = vmul.f32 %v866_v0, %v215_v10  ;;  %v216_v14 = vld [vmem:[%s871_s21 + $0x30] sm:$0xff]  ;;  %v217_v15 = vld [vmem:[%s871_s21 + $0x38] sm:$0xff]  ;;  %v218_v24 = vld [vmem:[%s871_s21 + $0x40] sm:$0xff] }
  0x14   : > { %v352_v16 = vadd.f32 %v876_v1, %v281_v5  ;;  %v353_v17 = vadd.f32 %v876_v1, %v282_v6  ;;  %v354_v18 = vadd.f32 %v876_v1, %v283_v7  ;;  %v287_v19 = vmul.f32 %v866_v0, %v216_v14  ;;  %v219_v32 = vld [vmem:[%s871_s21 + $0x48] sm:$0xff]  ;;  %v220_v33 = vld [vmem:[%s871_s21 + $0x50] sm:$0xff]  ;;  %v221_v34 = vld [vmem:[%s871_s21 + $0x58] sm:$0xff] }
  0x15   : > { %v355_v20 = vadd.f32 %v876_v1, %v284_v11  ;;  %v356_v21 = vadd.f32 %v876_v1, %v285_v12  ;;  %v357_v22 = vadd.f32 %v876_v1, %v286_v13  ;;  %v288_v23 = vmul.f32 %v866_v0, %v217_v15  ;;  %v222_v46 = vld [vmem:[%s871_s21 + $0x60] sm:$0xff]  ;;  %v223_v47 = vld [vmem:[%s871_s21 + $0x68] sm:$0xff]  ;;  %v224_v58 = vld [vmem:[%s871_s21 + $0x70] sm:$0xff] }
  0x16   : > { %vm416_vm0 = vcmp.ge.f32.partialorder %v352_v16, 0.0  ;;  %v480_v25 = vmul.f32 0.01, %v352_v16  ;;  %vm417_vm1 = vcmp.ge.f32.partialorder %v353_v17, 0.0  ;;  %v481_v26 = vmul.f32 0.01, %v353_v17 }
  0x17   : > { %vm418_vm2 = vcmp.ge.f32.partialorder %v354_v18, 0.0  ;;  %v482_v27 = vmul.f32 0.01, %v354_v18  ;;  %vm419_vm3 = vcmp.ge.f32.partialorder %v355_v20, 0.0  ;;  %v483_v28 = vmul.f32 0.01, %v355_v20 }
  0x18   : > { %v544_v29 = vsel %vm416_vm0, %v352_v16, %v480_v25  ;;  %v545_v30 = vsel %vm417_vm1, %v353_v17, %v481_v26  ;;  %vm420_vm4 = vcmp.ge.f32.partialorder %v356_v21, 0.0  ;;  %v484_v31 = vmul.f32 0.01, %v356_v21  ;;  %v225_v59 = vld [vmem:[%s871_s21 + $0x78] sm:$0xff]  ;;  %v226_v6 = vld [vmem:[%s871_s21 + $0x80] sm:$0xff]  ;;  %v227_v7 = vld [vmem:[%s871_s21 + $0x88] sm:$0xff] }
  0x19   : > { %608 = vst [vmem:[%s904_s26] sm:$0xff] %v544_v29  ;;  %609 = vst [vmem:[%s904_s26 + $0x8] sm:$0xff] %v545_v30  ;;  %v546_v35 = vsel %vm418_vm2, %v354_v18, %v482_v27  ;;  %v547_v36 = vsel %vm419_vm3, %v355_v20, %v483_v28  ;;  %vm421_vm5 = vcmp.ge.f32.partialorder %v357_v22, 0.0  ;;  %v485_v37 = vmul.f32 0.01, %v357_v22  ;;  %v228_v12 = vld [vmem:[%s871_s21 + $0x90] sm:$0xff]  ;;  %v229_v13 = vld [vmem:[%s871_s21 + $0x98] sm:$0xff] }
  0x1a   : > { %610 = vst [vmem:[%s904_s26 + $0x10] sm:$0xff] %v546_v35  ;;  %611 = vst [vmem:[%s904_s26 + $0x18] sm:$0xff] %v547_v36  ;;  %v548_v38 = vsel %vm420_vm4, %v356_v21, %v484_v31  ;;  %v358_v39 = vadd.f32 %v876_v1, %v287_v19  ;;  %v359_v40 = vadd.f32 %v876_v1, %v288_v23  ;;  %v231_v25 = vld [vmem:[%s871_s21 + $0xa8] sm:$0xff]  ;;  %v232_v36 = vld [vmem:[%s871_s21 + $0xb0] sm:$0xff] }
  0x1b   : > { %v289_v41 = vmul.f32 %v866_v0, %v218_v24  ;;  %612 = vst [vmem:[%s904_s26 + $0x20] sm:$0xff] %v548_v38  ;;  %v549_v42 = vsel %vm421_vm5, %v357_v22, %v485_v37  ;;  %v290_v43 = vmul.f32 %v866_v0, %v219_v32  ;;  %v291_v44 = vmul.f32 %v866_v0, %v220_v33  ;;  %v230_v24 = vld [vmem:[%s871_s21 + $0xa0] sm:$0xff]  ;;  %v233_v37 = vld [vmem:[%s871_s21 + $0xb8] sm:$0xff] }
  0x1c   : > { %v292_v45 = vmul.f32 %v866_v0, %v221_v34  ;;  %613 = vst [vmem:[%s904_s26 + $0x28] sm:$0xff] %v549_v42  ;;  %vm422_vm6 = vcmp.ge.f32.partialorder %v358_v39, 0.0  ;;  %v486_v48 = vmul.f32 0.01, %v358_v39  ;;  %vm423_vm7 = vcmp.ge.f32.partialorder %v359_v40, 0.0 }
  0x1d   : > { %v487_v49 = vmul.f32 0.01, %v359_v40  ;;  %v360_v50 = vadd.f32 %v876_v1, %v289_v41  ;;  %v361_v51 = vadd.f32 %v876_v1, %v290_v43  ;;  %v362_v52 = vadd.f32 %v876_v1, %v291_v44 }
  0x1e   : > { %v363_v53 = vadd.f32 %v876_v1, %v292_v45  ;;  %v550_v54 = vsel %vm422_vm6, %v358_v39, %v486_v48  ;;  %v293_v56 = vmul.f32 %v866_v0, %v222_v46  ;;  %v294_v57 = vmul.f32 %v866_v0, %v223_v47  ;;  %v234_v46 = vld [vmem:[%s871_s21 + $0xc0] sm:$0xff]  ;;  %v235_v47 = vld [vmem:[%s871_s21 + $0xc8] sm:$0xff] }
  0x1f   : > { %v551_v55 = vsel %vm423_vm7, %v359_v40, %v487_v49  ;;  %614 = vst [vmem:[%s904_s26 + $0x30] sm:$0xff] %v550_v54  ;;  %vm424_vm8 = vcmp.ge.f32.partialorder %v360_v50, 0.0  ;;  %v488_v60 = vmul.f32 0.01, %v360_v50  ;;  %vm425_vm9 = vcmp.ge.f32.partialorder %v361_v51, 0.0 }
  0x20   : > { %615 = vst [vmem:[%s904_s26 + $0x38] sm:$0xff] %v551_v55  ;;  %v489_v61 = vmul.f32 0.01, %v361_v51  ;;  %vm426_vm10 = vcmp.ge.f32.partialorder %v362_v52, 0.0  ;;  %v490_v62 = vmul.f32 0.01, %v362_v52  ;;  %v364_v4 = vadd.f32 %v876_v1, %v293_v56 }
  0x21   : > { %vm427_vm11 = vcmp.ge.f32.partialorder %v363_v53, 0.0  ;;  %v491_v63 = vmul.f32 0.01, %v363_v53  ;;  %v552_v2 = vsel %vm424_vm8, %v360_v50, %v488_v60  ;;  %v365_v5 = vadd.f32 %v876_v1, %v294_v57 }
  0x22   : > { %v553_v3 = vsel %vm425_vm9, %v361_v51, %v489_v61  ;;  %616 = vst [vmem:[%s904_s26 + $0x40] sm:$0xff] %v552_v2  ;;  %v554_v8 = vsel %vm426_vm10, %v362_v52, %v490_v62  ;;  %v295_v10 = vmul.f32 %v866_v0, %v224_v58  ;;  %v296_v11 = vmul.f32 %v866_v0, %v225_v59  ;;  %v236_v52 = vld [vmem:[%s871_s21 + $0xd0] sm:$0xff]  ;;  %v238_v2 = vld [vmem:[%s871_s21 + $0xe0] sm:$0xff] }
  0x23   : > { %617 = vst [vmem:[%s904_s26 + $0x48] sm:$0xff] %v553_v3  ;;  %v555_v9 = vsel %vm427_vm11, %v363_v53, %v491_v63  ;;  %618 = vst [vmem:[%s904_s26 + $0x50] sm:$0xff] %v554_v8  ;;  %vm428_vm12 = vcmp.ge.f32.partialorder %v364_v4, 0.0  ;;  %v492_v14 = vmul.f32 0.01, %v364_v4  ;;  %vm429_vm13 = vcmp.ge.f32.partialorder %v365_v5, 0.0 }
  0x24   : > { %619 = vst [vmem:[%s904_s26 + $0x58] sm:$0xff] %v555_v9  ;;  %v493_v15 = vmul.f32 0.01, %v365_v5  ;;  %v366_v16 = vadd.f32 %v876_v1, %v295_v10  ;;  %v367_v17 = vadd.f32 %v876_v1, %v296_v11  ;;  %v297_v18 = vmul.f32 %v866_v0, %v226_v6  ;;  %v237_v53 = vld [vmem:[%s871_s21 + $0xd8] sm:$0xff]  ;;  %v239_v3 = vld [vmem:[%s871_s21 + $0xe8] sm:$0xff] }
  0x25   : > { %v298_v19 = vmul.f32 %v866_v0, %v227_v7  ;;  %v556_v20 = vsel %vm428_vm12, %v364_v4, %v492_v14  ;;  %v299_v22 = vmul.f32 %v866_v0, %v228_v12  ;;  %v300_v23 = vmul.f32 %v866_v0, %v229_v13  ;;  %v240_v14 = vld [vmem:[%s871_s21 + $0xf0] sm:$0xff] }
  0x26   : > { %v557_v21 = vsel %vm429_vm13, %v365_v5, %v493_v15  ;;  %620 = vst [vmem:[%s904_s26 + $0x60] sm:$0xff] %v556_v20  ;;  %vm430_vm14 = vcmp.ge.f32.partialorder %v366_v16, 0.0  ;;  %v494_v26 = vmul.f32 0.01, %v366_v16  ;;  %vm431_vm15 = vcmp.ge.f32.partialorder %v367_v17, 0.0  ;;  %v241_v15 = vld [vmem:[%s871_s21 + $0xf8] sm:$0xff] }
  0x27   : > { %621 = vst [vmem:[%s904_s26 + $0x68] sm:$0xff] %v557_v21  ;;  %v495_v27 = vmul.f32 0.01, %v367_v17  ;;  %v368_v28 = vadd.f32 %v876_v1, %v297_v18  ;;  %v369_v29 = vadd.f32 %v876_v1, %v298_v19  ;;  %v370_v30 = vadd.f32 %v876_v1, %v299_v22 }
  0x28   : > { %v371_v31 = vadd.f32 %v876_v1, %v300_v23  ;;  %v558_v32 = vsel %vm430_vm14, %v366_v16, %v494_v26  ;;  %v301_v34 = vmul.f32 %v866_v0, %v230_v24  ;;  %v302_v35 = vmul.f32 %v866_v0, %v231_v25  ;;  %v242_v24 = vld [vmem:[%s871_s21 + $0x100] sm:$0xff]  ;;  %v243_v25 = vld [vmem:[%s871_s21 + $0x108] sm:$0xff] }
  0x29   : > { %v559_v33 = vsel %vm431_vm15, %v367_v17, %v495_v27  ;;  %622 = vst [vmem:[%s904_s26 + $0x70] sm:$0xff] %v558_v32  ;;  %vm432_vm0 = vcmp.ge.f32.partialorder %v368_v28, 0.0  ;;  %v496_v38 = vmul.f32 0.01, %v368_v28  ;;  %vm433_vm1 = vcmp.ge.f32.partialorder %v369_v29, 0.0 }
  0x2a   : > { %623 = vst [vmem:[%s904_s26 + $0x78] sm:$0xff] %v559_v33  ;;  %v497_v39 = vmul.f32 0.01, %v369_v29  ;;  %vm434_vm2 = vcmp.ge.f32.partialorder %v370_v30, 0.0  ;;  %v498_v40 = vmul.f32 0.01, %v370_v30  ;;  %v372_v44 = vadd.f32 %v876_v1, %v301_v34 }
  0x2b   : > { %vm435_vm3 = vcmp.ge.f32.partialorder %v371_v31, 0.0  ;;  %v499_v41 = vmul.f32 0.01, %v371_v31  ;;  %v560_v42 = vsel %vm432_vm0, %v368_v28, %v496_v38  ;;  %v373_v45 = vadd.f32 %v876_v1, %v302_v35 }
  0x2c   : > { %v561_v43 = vsel %vm433_vm1, %v369_v29, %v497_v39  ;;  %624 = vst [vmem:[%s904_s26 + $0x80] sm:$0xff] %v560_v42  ;;  %v562_v48 = vsel %vm434_vm2, %v370_v30, %v498_v40  ;;  %v303_v50 = vmul.f32 %v866_v0, %v232_v36  ;;  %v304_v51 = vmul.f32 %v866_v0, %v233_v37  ;;  %v244_v30 = vld [vmem:[%s871_s21 + $0x110] sm:$0xff]  ;;  %v246_v42 = vld [vmem:[%s871_s21 + $0x120] sm:$0xff] }
  0x2d   : > { %625 = vst [vmem:[%s904_s26 + $0x88] sm:$0xff] %v561_v43  ;;  %v563_v49 = vsel %vm435_vm3, %v371_v31, %v499_v41  ;;  %626 = vst [vmem:[%s904_s26 + $0x90] sm:$0xff] %v562_v48  ;;  %vm436_vm4 = vcmp.ge.f32.partialorder %v372_v44, 0.0  ;;  %v500_v54 = vmul.f32 0.01, %v372_v44  ;;  %vm437_vm5 = vcmp.ge.f32.partialorder %v373_v45, 0.0 }
  0x2e   : > { %627 = vst [vmem:[%s904_s26 + $0x98] sm:$0xff] %v563_v49  ;;  %v501_v55 = vmul.f32 0.01, %v373_v45  ;;  %v374_v56 = vadd.f32 %v876_v1, %v303_v50  ;;  %v375_v57 = vadd.f32 %v876_v1, %v304_v51  ;;  %v305_v58 = vmul.f32 %v866_v0, %v234_v46  ;;  %v245_v31 = vld [vmem:[%s871_s21 + $0x118] sm:$0xff]  ;;  %v247_v43 = vld [vmem:[%s871_s21 + $0x128] sm:$0xff] }
  0x2f   : > { %v306_v59 = vmul.f32 %v866_v0, %v235_v47  ;;  %v564_v60 = vsel %vm436_vm4, %v372_v44, %v500_v54  ;;  %v307_v62 = vmul.f32 %v866_v0, %v236_v52  ;;  %v308_v63 = vmul.f32 %v866_v0, %v237_v53  ;;  %v248_v54 = vld [vmem:[%s871_s21 + $0x130] sm:$0xff] }
  0x30   : > { %v565_v61 = vsel %vm437_vm5, %v373_v45, %v501_v55  ;;  %628 = vst [vmem:[%s904_s26 + $0xa0] sm:$0xff] %v564_v60  ;;  %vm438_vm6 = vcmp.ge.f32.partialorder %v374_v56, 0.0  ;;  %v502_v4 = vmul.f32 0.01, %v374_v56  ;;  %vm439_vm7 = vcmp.ge.f32.partialorder %v375_v57, 0.0  ;;  %v249_v55 = vld [vmem:[%s871_s21 + $0x138] sm:$0xff] }
  0x31   : > { %629 = vst [vmem:[%s904_s26 + $0xa8] sm:$0xff] %v565_v61  ;;  %v503_v5 = vmul.f32 0.01, %v375_v57  ;;  %v376_v6 = vadd.f32 %v876_v1, %v305_v58  ;;  %v377_v7 = vadd.f32 %v876_v1, %v306_v59  ;;  %v378_v8 = vadd.f32 %v876_v1, %v307_v62 }
  0x32   : > { %v379_v9 = vadd.f32 %v876_v1, %v308_v63  ;;  %v566_v10 = vsel %vm438_vm6, %v374_v56, %v502_v4  ;;  %v309_v12 = vmul.f32 %v866_v0, %v238_v2  ;;  %v310_v13 = vmul.f32 %v866_v0, %v239_v3  ;;  %v250_v2 = vld [vmem:[%s871_s21 + $0x140] sm:$0xff]  ;;  %v251_v3 = vld [vmem:[%s871_s21 + $0x148] sm:$0xff] }
  0x33   : > { %v567_v11 = vsel %vm439_vm7, %v375_v57, %v503_v5  ;;  %630 = vst [vmem:[%s904_s26 + $0xb0] sm:$0xff] %v566_v10  ;;  %vm440_vm8 = vcmp.ge.f32.partialorder %v376_v6, 0.0  ;;  %v504_v16 = vmul.f32 0.01, %v376_v6  ;;  %vm441_vm9 = vcmp.ge.f32.partialorder %v377_v7, 0.0 }
  0x34   : > { %631 = vst [vmem:[%s904_s26 + $0xb8] sm:$0xff] %v567_v11  ;;  %v505_v17 = vmul.f32 0.01, %v377_v7  ;;  %vm442_vm10 = vcmp.ge.f32.partialorder %v378_v8, 0.0  ;;  %v506_v18 = vmul.f32 0.01, %v378_v8  ;;  %v380_v22 = vadd.f32 %v876_v1, %v309_v12 }
  0x35   : > { %vm443_vm11 = vcmp.ge.f32.partialorder %v379_v9, 0.0  ;;  %v507_v19 = vmul.f32 0.01, %v379_v9  ;;  %v568_v20 = vsel %vm440_vm8, %v376_v6, %v504_v16  ;;  %v381_v23 = vadd.f32 %v876_v1, %v310_v13 }
  0x36   : > { %v569_v21 = vsel %vm441_vm9, %v377_v7, %v505_v17  ;;  %632 = vst [vmem:[%s904_s26 + $0xc0] sm:$0xff] %v568_v20  ;;  %v570_v26 = vsel %vm442_vm10, %v378_v8, %v506_v18  ;;  %v311_v28 = vmul.f32 %v866_v0, %v240_v14  ;;  %v312_v29 = vmul.f32 %v866_v0, %v241_v15  ;;  %v252_v8 = vld [vmem:[%s871_s21 + $0x150] sm:$0xff]  ;;  %v254_v20 = vld [vmem:[%s871_s21 + $0x160] sm:$0xff] }
  0x37   : > { %633 = vst [vmem:[%s904_s26 + $0xc8] sm:$0xff] %v569_v21  ;;  %v571_v27 = vsel %vm443_vm11, %v379_v9, %v507_v19  ;;  %634 = vst [vmem:[%s904_s26 + $0xd0] sm:$0xff] %v570_v26  ;;  %vm444_vm12 = vcmp.ge.f32.partialorder %v380_v22, 0.0  ;;  %v508_v32 = vmul.f32 0.01, %v380_v22  ;;  %vm445_vm13 = vcmp.ge.f32.partialorder %v381_v23, 0.0 }
  0x38   : > { %635 = vst [vmem:[%s904_s26 + $0xd8] sm:$0xff] %v571_v27  ;;  %v509_v33 = vmul.f32 0.01, %v381_v23  ;;  %v382_v34 = vadd.f32 %v876_v1, %v311_v28  ;;  %v383_v35 = vadd.f32 %v876_v1, %v312_v29  ;;  %v313_v36 = vmul.f32 %v866_v0, %v242_v24  ;;  %v253_v9 = vld [vmem:[%s871_s21 + $0x158] sm:$0xff]  ;;  %v255_v21 = vld [vmem:[%s871_s21 + $0x168] sm:$0xff] }
  0x39   : > { %v314_v37 = vmul.f32 %v866_v0, %v243_v25  ;;  %v572_v38 = vsel %vm444_vm12, %v380_v22, %v508_v32  ;;  %v315_v40 = vmul.f32 %v866_v0, %v244_v30  ;;  %v316_v41 = vmul.f32 %v866_v0, %v245_v31  ;;  %v256_v32 = vld [vmem:[%s871_s21 + $0x170] sm:$0xff] }
  0x3a   : > { %v573_v39 = vsel %vm445_vm13, %v381_v23, %v509_v33  ;;  %636 = vst [vmem:[%s904_s26 + $0xe0] sm:$0xff] %v572_v38  ;;  %vm446_vm14 = vcmp.ge.f32.partialorder %v382_v34, 0.0  ;;  %v510_v44 = vmul.f32 0.01, %v382_v34  ;;  %vm447_vm15 = vcmp.ge.f32.partialorder %v383_v35, 0.0  ;;  %v257_v33 = vld [vmem:[%s871_s21 + $0x178] sm:$0xff] }
  0x3b   : > { %637 = vst [vmem:[%s904_s26 + $0xe8] sm:$0xff] %v573_v39  ;;  %v511_v45 = vmul.f32 0.01, %v383_v35  ;;  %v384_v46 = vadd.f32 %v876_v1, %v313_v36  ;;  %v385_v47 = vadd.f32 %v876_v1, %v314_v37  ;;  %v386_v48 = vadd.f32 %v876_v1, %v315_v40 }
  0x3c   : > { %v387_v49 = vadd.f32 %v876_v1, %v316_v41  ;;  %v574_v50 = vsel %vm446_vm14, %v382_v34, %v510_v44  ;;  %v317_v52 = vmul.f32 %v866_v0, %v246_v42  ;;  %v318_v53 = vmul.f32 %v866_v0, %v247_v43  ;;  %v258_v42 = vld [vmem:[%s871_s21 + $0x180] sm:$0xff]  ;;  %v259_v43 = vld [vmem:[%s871_s21 + $0x188] sm:$0xff] }
  0x3d   : > { %v575_v51 = vsel %vm447_vm15, %v383_v35, %v511_v45  ;;  %638 = vst [vmem:[%s904_s26 + $0xf0] sm:$0xff] %v574_v50  ;;  %vm448_vm0 = vcmp.ge.f32.partialorder %v384_v46, 0.0  ;;  %v512_v56 = vmul.f32 0.01, %v384_v46  ;;  %vm449_vm1 = vcmp.ge.f32.partialorder %v385_v47, 0.0 }
  0x3e   : > { %639 = vst [vmem:[%s904_s26 + $0xf8] sm:$0xff] %v575_v51  ;;  %v513_v57 = vmul.f32 0.01, %v385_v47  ;;  %vm450_vm2 = vcmp.ge.f32.partialorder %v386_v48, 0.0  ;;  %v514_v58 = vmul.f32 0.01, %v386_v48  ;;  %v388_v62 = vadd.f32 %v876_v1, %v317_v52 }
  0x3f   : > { %vm451_vm3 = vcmp.ge.f32.partialorder %v387_v49, 0.0  ;;  %v515_v59 = vmul.f32 0.01, %v387_v49  ;;  %v576_v60 = vsel %vm448_vm0, %v384_v46, %v512_v56  ;;  %v389_v63 = vadd.f32 %v876_v1, %v318_v53 }
  0x40   : > { %v577_v61 = vsel %vm449_vm1, %v385_v47, %v513_v57  ;;  %640 = vst [vmem:[%s904_s26 + $0x100] sm:$0xff] %v576_v60  ;;  %v578_v4 = vsel %vm450_vm2, %v386_v48, %v514_v58  ;;  %v319_v6 = vmul.f32 %v866_v0, %v248_v54  ;;  %v320_v7 = vmul.f32 %v866_v0, %v249_v55  ;;  %v260_v48 = vld [vmem:[%s871_s21 + $0x190] sm:$0xff]  ;;  %v262_v60 = vld [vmem:[%s871_s21 + $0x1a0] sm:$0xff] }
  0x41   : > { %641 = vst [vmem:[%s904_s26 + $0x108] sm:$0xff] %v577_v61  ;;  %v579_v5 = vsel %vm451_vm3, %v387_v49, %v515_v59  ;;  %642 = vst [vmem:[%s904_s26 + $0x110] sm:$0xff] %v578_v4  ;;  %vm452_vm4 = vcmp.ge.f32.partialorder %v388_v62, 0.0  ;;  %v516_v10 = vmul.f32 0.01, %v388_v62  ;;  %vm453_vm5 = vcmp.ge.f32.partialorder %v389_v63, 0.0 }
  0x42   : > { %643 = vst [vmem:[%s904_s26 + $0x118] sm:$0xff] %v579_v5  ;;  %v517_v11 = vmul.f32 0.01, %v389_v63  ;;  %v390_v12 = vadd.f32 %v876_v1, %v319_v6  ;;  %v391_v13 = vadd.f32 %v876_v1, %v320_v7  ;;  %v321_v14 = vmul.f32 %v866_v0, %v250_v2  ;;  %v261_v49 = vld [vmem:[%s871_s21 + $0x198] sm:$0xff]  ;;  %v263_v61 = vld [vmem:[%s871_s21 + $0x1a8] sm:$0xff] }
  0x43   : > { %v322_v15 = vmul.f32 %v866_v0, %v251_v3  ;;  %v580_v16 = vsel %vm452_vm4, %v388_v62, %v516_v10  ;;  %v323_v18 = vmul.f32 %v866_v0, %v252_v8  ;;  %v324_v19 = vmul.f32 %v866_v0, %v253_v9  ;;  %v264_v10 = vld [vmem:[%s871_s21 + $0x1b0] sm:$0xff] }
  0x44   : > { %v581_v17 = vsel %vm453_vm5, %v389_v63, %v517_v11  ;;  %644 = vst [vmem:[%s904_s26 + $0x120] sm:$0xff] %v580_v16  ;;  %vm454_vm6 = vcmp.ge.f32.partialorder %v390_v12, 0.0  ;;  %v518_v22 = vmul.f32 0.01, %v390_v12  ;;  %vm455_vm7 = vcmp.ge.f32.partialorder %v391_v13, 0.0  ;;  %v265_v11 = vld [vmem:[%s871_s21 + $0x1b8] sm:$0xff] }
  0x45   : > { %645 = vst [vmem:[%s904_s26 + $0x128] sm:$0xff] %v581_v17  ;;  %v519_v23 = vmul.f32 0.01, %v391_v13  ;;  %v392_v24 = vadd.f32 %v876_v1, %v321_v14  ;;  %v393_v25 = vadd.f32 %v876_v1, %v322_v15  ;;  %v394_v26 = vadd.f32 %v876_v1, %v323_v18 }
  0x46   : > { %v395_v27 = vadd.f32 %v876_v1, %v324_v19  ;;  %v582_v28 = vsel %vm454_vm6, %v390_v12, %v518_v22  ;;  %v325_v30 = vmul.f32 %v866_v0, %v254_v20  ;;  %v326_v31 = vmul.f32 %v866_v0, %v255_v21  ;;  %v266_v20 = vld [vmem:[%s871_s21 + $0x1c0] sm:$0xff]  ;;  %v267_v21 = vld [vmem:[%s871_s21 + $0x1c8] sm:$0xff] }
  0x47   : > { %v583_v29 = vsel %vm455_vm7, %v391_v13, %v519_v23  ;;  %646 = vst [vmem:[%s904_s26 + $0x130] sm:$0xff] %v582_v28  ;;  %vm456_vm8 = vcmp.ge.f32.partialorder %v392_v24, 0.0  ;;  %v520_v34 = vmul.f32 0.01, %v392_v24  ;;  %vm457_vm9 = vcmp.ge.f32.partialorder %v393_v25, 0.0 }
  0x48   : > { %647 = vst [vmem:[%s904_s26 + $0x138] sm:$0xff] %v583_v29  ;;  %v521_v35 = vmul.f32 0.01, %v393_v25  ;;  %vm458_vm10 = vcmp.ge.f32.partialorder %v394_v26, 0.0  ;;  %v522_v36 = vmul.f32 0.01, %v394_v26  ;;  %v396_v40 = vadd.f32 %v876_v1, %v325_v30 }
  0x49   : > { %vm459_vm11 = vcmp.ge.f32.partialorder %v395_v27, 0.0  ;;  %v523_v37 = vmul.f32 0.01, %v395_v27  ;;  %v584_v38 = vsel %vm456_vm8, %v392_v24, %v520_v34  ;;  %v397_v41 = vadd.f32 %v876_v1, %v326_v31 }
  0x4a   : > { %v585_v39 = vsel %vm457_vm9, %v393_v25, %v521_v35  ;;  %648 = vst [vmem:[%s904_s26 + $0x140] sm:$0xff] %v584_v38  ;;  %v586_v44 = vsel %vm458_vm10, %v394_v26, %v522_v36  ;;  %v327_v46 = vmul.f32 %v866_v0, %v256_v32  ;;  %v328_v47 = vmul.f32 %v866_v0, %v257_v33  ;;  %v268_v26 = vld [vmem:[%s871_s21 + $0x1d0] sm:$0xff]  ;;  %v270_v38 = vld [vmem:[%s871_s21 + $0x1e0] sm:$0xff] }
  0x4b   : > { %649 = vst [vmem:[%s904_s26 + $0x148] sm:$0xff] %v585_v39  ;;  %v587_v45 = vsel %vm459_vm11, %v395_v27, %v523_v37  ;;  %650 = vst [vmem:[%s904_s26 + $0x150] sm:$0xff] %v586_v44  ;;  %vm460_vm12 = vcmp.ge.f32.partialorder %v396_v40, 0.0  ;;  %v524_v50 = vmul.f32 0.01, %v396_v40  ;;  %vm461_vm13 = vcmp.ge.f32.partialorder %v397_v41, 0.0 }
  0x4c   : > { %651 = vst [vmem:[%s904_s26 + $0x158] sm:$0xff] %v587_v45  ;;  %v525_v51 = vmul.f32 0.01, %v397_v41  ;;  %v398_v52 = vadd.f32 %v876_v1, %v327_v46  ;;  %v399_v53 = vadd.f32 %v876_v1, %v328_v47  ;;  %v329_v54 = vmul.f32 %v866_v0, %v258_v42  ;;  %v269_v27 = vld [vmem:[%s871_s21 + $0x1d8] sm:$0xff]  ;;  %v271_v39 = vld [vmem:[%s871_s21 + $0x1e8] sm:$0xff] }
  0x4d   : > { %v330_v55 = vmul.f32 %v866_v0, %v259_v43  ;;  %v588_v56 = vsel %vm460_vm12, %v396_v40, %v524_v50  ;;  %v331_v58 = vmul.f32 %v866_v0, %v260_v48  ;;  %v332_v59 = vmul.f32 %v866_v0, %v261_v49  ;;  %v272_v50 = vld [vmem:[%s871_s21 + $0x1f0] sm:$0xff] }
  0x4e   : > { %v589_v57 = vsel %vm461_vm13, %v397_v41, %v525_v51  ;;  %652 = vst [vmem:[%s904_s26 + $0x160] sm:$0xff] %v588_v56  ;;  %vm462_vm14 = vcmp.ge.f32.partialorder %v398_v52, 0.0  ;;  %v526_v62 = vmul.f32 0.01, %v398_v52  ;;  %vm463_vm15 = vcmp.ge.f32.partialorder %v399_v53, 0.0  ;;  %v273_v51 = vld [vmem:[%s871_s21 + $0x1f8] sm:$0xff] }
  0x4f   : > { %653 = vst [vmem:[%s904_s26 + $0x168] sm:$0xff] %v589_v57  ;;  %v527_v63 = vmul.f32 0.01, %v399_v53  ;;  %v400_v2 = vadd.f32 %v876_v1, %v329_v54  ;;  %v401_v3 = vadd.f32 %v876_v1, %v330_v55  ;;  %v402_v4 = vadd.f32 %v876_v1, %v331_v58 }
  0x50   : > { %v403_v5 = vadd.f32 %v876_v1, %v332_v59  ;;  %v590_v6 = vsel %vm462_vm14, %v398_v52, %v526_v62  ;;  %v333_v8 = vmul.f32 %v866_v0, %v262_v60  ;;  %v334_v9 = vmul.f32 %v866_v0, %v263_v61 }
  0x51   : > { %v591_v7 = vsel %vm463_vm15, %v399_v53, %v527_v63  ;;  %654 = vst [vmem:[%s904_s26 + $0x170] sm:$0xff] %v590_v6  ;;  %vm464_vm0 = vcmp.ge.f32.partialorder %v400_v2, 0.0  ;;  %v528_v12 = vmul.f32 0.01, %v400_v2  ;;  %vm465_vm1 = vcmp.ge.f32.partialorder %v401_v3, 0.0 }
  0x52   : > { %655 = vst [vmem:[%s904_s26 + $0x178] sm:$0xff] %v591_v7  ;;  %v529_v13 = vmul.f32 0.01, %v401_v3  ;;  %vm466_vm2 = vcmp.ge.f32.partialorder %v402_v4, 0.0  ;;  %v530_v14 = vmul.f32 0.01, %v402_v4  ;;  %v404_v18 = vadd.f32 %v876_v1, %v333_v8 }
  0x53   : > { %vm467_vm3 = vcmp.ge.f32.partialorder %v403_v5, 0.0  ;;  %v531_v15 = vmul.f32 0.01, %v403_v5  ;;  %v592_v16 = vsel %vm464_vm0, %v400_v2, %v528_v12  ;;  %v405_v19 = vadd.f32 %v876_v1, %v334_v9 }
  0x54   : > { %v593_v17 = vsel %vm465_vm1, %v401_v3, %v529_v13  ;;  %656 = vst [vmem:[%s904_s26 + $0x180] sm:$0xff] %v592_v16  ;;  %v594_v22 = vsel %vm466_vm2, %v402_v4, %v530_v14  ;;  %v335_v24 = vmul.f32 %v866_v0, %v264_v10  ;;  %v336_v25 = vmul.f32 %v866_v0, %v265_v11 }
  0x55   : > { %657 = vst [vmem:[%s904_s26 + $0x188] sm:$0xff] %v593_v17  ;;  %v595_v23 = vsel %vm467_vm3, %v403_v5, %v531_v15  ;;  %658 = vst [vmem:[%s904_s26 + $0x190] sm:$0xff] %v594_v22  ;;  %vm468_vm4 = vcmp.ge.f32.partialorder %v404_v18, 0.0  ;;  %v532_v28 = vmul.f32 0.01, %v404_v18  ;;  %vm469_vm5 = vcmp.ge.f32.partialorder %v405_v19, 0.0 }
  0x56   : > { %659 = vst [vmem:[%s904_s26 + $0x198] sm:$0xff] %v595_v23  ;;  %v533_v29 = vmul.f32 0.01, %v405_v19  ;;  %v406_v30 = vadd.f32 %v876_v1, %v335_v24  ;;  %v407_v31 = vadd.f32 %v876_v1, %v336_v25  ;;  %v337_v32 = vmul.f32 %v866_v0, %v266_v20 }
  0x57   : > { %v338_v33 = vmul.f32 %v866_v0, %v267_v21  ;;  %v596_v34 = vsel %vm468_vm4, %v404_v18, %v532_v28  ;;  %v339_v36 = vmul.f32 %v866_v0, %v268_v26  ;;  %v340_v37 = vmul.f32 %v866_v0, %v269_v27 }
  0x58   : > { %v597_v35 = vsel %vm469_vm5, %v405_v19, %v533_v29  ;;  %660 = vst [vmem:[%s904_s26 + $0x1a0] sm:$0xff] %v596_v34  ;;  %vm470_vm6 = vcmp.ge.f32.partialorder %v406_v30, 0.0  ;;  %v534_v40 = vmul.f32 0.01, %v406_v30  ;;  %vm471_vm7 = vcmp.ge.f32.partialorder %v407_v31, 0.0 }
  0x59   : > { %661 = vst [vmem:[%s904_s26 + $0x1a8] sm:$0xff] %v597_v35  ;;  %v535_v41 = vmul.f32 0.01, %v407_v31  ;;  %v408_v42 = vadd.f32 %v876_v1, %v337_v32  ;;  %v409_v43 = vadd.f32 %v876_v1, %v338_v33  ;;  %v410_v44 = vadd.f32 %v876_v1, %v339_v36 }
  0x5a   : > { %v411_v45 = vadd.f32 %v876_v1, %v340_v37  ;;  %v598_v46 = vsel %vm470_vm6, %v406_v30, %v534_v40  ;;  %v341_v48 = vmul.f32 %v866_v0, %v270_v38  ;;  %v342_v49 = vmul.f32 %v866_v0, %v271_v39 }
  0x5b   : > { %v599_v47 = vsel %vm471_vm7, %v407_v31, %v535_v41  ;;  %662 = vst [vmem:[%s904_s26 + $0x1b0] sm:$0xff] %v598_v46  ;;  %vm472_vm8 = vcmp.ge.f32.partialorder %v408_v42, 0.0  ;;  %v536_v52 = vmul.f32 0.01, %v408_v42  ;;  %vm473_vm9 = vcmp.ge.f32.partialorder %v409_v43, 0.0 }
  0x5c   : > { %663 = vst [vmem:[%s904_s26 + $0x1b8] sm:$0xff] %v599_v47  ;;  %v537_v53 = vmul.f32 0.01, %v409_v43  ;;  %vm474_vm10 = vcmp.ge.f32.partialorder %v410_v44, 0.0  ;;  %v538_v54 = vmul.f32 0.01, %v410_v44  ;;  %v412_v58 = vadd.f32 %v876_v1, %v341_v48 }
  0x5d   : > { %vm475_vm11 = vcmp.ge.f32.partialorder %v411_v45, 0.0  ;;  %v539_v55 = vmul.f32 0.01, %v411_v45  ;;  %v600_v56 = vsel %vm472_vm8, %v408_v42, %v536_v52  ;;  %v413_v59 = vadd.f32 %v876_v1, %v342_v49 }
  0x5e   : > { %v601_v57 = vsel %vm473_vm9, %v409_v43, %v537_v53  ;;  %664 = vst [vmem:[%s904_s26 + $0x1c0] sm:$0xff] %v600_v56  ;;  %v602_v60 = vsel %vm474_vm10, %v410_v44, %v538_v54  ;;  %v343_v62 = vmul.f32 %v866_v0, %v272_v50  ;;  %v344_v63 = vmul.f32 %v866_v0, %v273_v51 }
  0x5f   : > { %665 = vst [vmem:[%s904_s26 + $0x1c8] sm:$0xff] %v601_v57  ;;  %v603_v61 = vsel %vm475_vm11, %v411_v45, %v539_v55  ;;  %666 = vst [vmem:[%s904_s26 + $0x1d0] sm:$0xff] %v602_v60  ;;  %vm476_vm12 = vcmp.ge.f32.partialorder %v412_v58, 0.0  ;;  %v540_v2 = vmul.f32 0.01, %v412_v58  ;;  %vm477_vm13 = vcmp.ge.f32.partialorder %v413_v59, 0.0 }
  0x60   : > { %667 = vst [vmem:[%s904_s26 + $0x1d8] sm:$0xff] %v603_v61  ;;  %v541_v3 = vmul.f32 0.01, %v413_v59  ;;  %v414_v4 = vadd.f32 %v876_v1, %v343_v62  ;;  %v415_v5 = vadd.f32 %v876_v1, %v344_v63 }
  0x61   : > { %v604_v6 = vsel %vm476_vm12, %v412_v58, %v540_v2 }
  0x62   : > { %v605_v7 = vsel %vm477_vm13, %v413_v59, %v541_v3  ;;  %668 = vst [vmem:[%s904_s26 + $0x1e0] sm:$0xff] %v604_v6  ;;  %vm478_vm14 = vcmp.ge.f32.partialorder %v414_v4, 0.0  ;;  %v542_v8 = vmul.f32 0.01, %v414_v4  ;;  %vm479_vm15 = vcmp.ge.f32.partialorder %v415_v5, 0.0 }
  0x63   : > { %669 = vst [vmem:[%s904_s26 + $0x1e8] sm:$0xff] %v605_v7  ;;  %v543_v0 = vmul.f32 0.01, %v415_v5 }
  0x64   : > { %v606_v9 = vsel %vm478_vm14, %v414_v4, %v542_v8 }
  0x65   : > { %v607_v10 = vsel %vm479_vm15, %v415_v5, %v543_v0  ;;  %670 = vst [vmem:[%s904_s26 + $0x1f0] sm:$0xff] %v606_v9 }
  0x66   : > { %671 = vst [vmem:[%s904_s26 + $0x1f8] sm:$0xff] %v607_v10 }
  0x67 PF: > { %s13_s14 = sadd.s32 1, %s820_s14   ;;  %s1152_s12 = smov %s816_s13 }
  0x68   : > { %p10_p5 = scmp.ge.s32.totalorder %s13_s14, 6   ;;  %s1153_s13 = smov %s1155_s15 }
  0x6a   :  { %12 = sbr.rel (!%p10_p5) target bundleno = 2 (0x2), region = 62 }

</bundles_post_ra>
